<compile_context>
chip_gen: v7x
topology: tpu7x:2x2x1
jax: 0.10.0
libtpu: 0.0.40
codegen_flags: <defaults>
</compile_context>

<pallas_src>
import jax
import jax.numpy as jnp
from jax.experimental import pallas as pl
from jax.experimental.pallas import tpu as pltpu


def encoder_layer_kernel(x_full_ref, wq_ref, wk_ref, wv_ref, wo_ref,
                         w1_ref, w2_ref, g1_ref, b1_ref, g2_ref, b2_ref,
                         o_ref, k_scr, v_scr, *, eps=1e-5):
    qi = pl.program_id(1)
    cdt = wq_ref.dtype                         # MXU operand dtype (bf16 or f32)
    n_head, d_head, seq_len = k_scr.shape      # lane-dense K/V scratch layout
    tile_q = o_ref.shape[1]
    d_model = o_ref.shape[2]

    # ---- K/V projections: once per batch element, reused across query tiles.
    @pl.when(qi == 0)
    def _():
        xf = x_full_ref[0].astype(cdt)                                     # (S, D)
        k = jnp.dot(xf, wk_ref[...], preferred_element_type=jnp.float32)  # (S, D)
        v = jnp.dot(xf, wv_ref[...], preferred_element_type=jnp.float32)
        # head-major then per-head minor transpose -> lane-dense (H, dh, S).
        k_hm = k.reshape(seq_len, n_head, d_head).transpose(1, 0, 2)      # (H, S, dh)
        v_hm = v.reshape(seq_len, n_head, d_head).transpose(1, 0, 2)
        k_scr[...] = jnp.transpose(k_hm, (0, 2, 1)).astype(cdt)           # (H, dh, S)
        v_scr[...] = jnp.transpose(v_hm, (0, 2, 1)).astype(cdt)

    # ---- query tile sliced from the resident full-sequence block -----------
    q0 = pl.multiple_of(qi * tile_q, tile_q)
    x_res = x_full_ref[0, pl.ds(q0, tile_q), :].astype(jnp.float32)        # (TQ, D)

    # ---- Q projection (attention scale already folded into wq) -------------
    q = jnp.dot(x_res.astype(cdt), wq_ref[...],
                preferred_element_type=jnp.float32)                        # (TQ, D)
    qh = q.reshape(tile_q, n_head, d_head).transpose(1, 0, 2).astype(cdt)  # (H, TQ, dh)

    # ---- batched per-head attention ----------------------------------------
    # scores: canonical contraction over d_head against lane-dense K (H, dh, S)
    s = jnp.einsum('hqd,hds->hqs', qh, k_scr[...],
                   preferred_element_type=jnp.float32)                     # (H, TQ, S)
    s = s - jnp.max(s, axis=-1, keepdims=True)
    p = jnp.exp(s)
    p = p * pl.reciprocal(jnp.sum(p, axis=-1, keepdims=True), approx=True)

    # context: contraction over S (last dim of both operands), V is (H, dh, S)
    ctx = jnp.einsum('hqs,hds->hqd', p.astype(cdt), v_scr[...],
                     preferred_element_type=jnp.float32)                   # (H, TQ, dh)
    attn = ctx.transpose(1, 0, 2).reshape(tile_q, d_model)                 # (TQ, D)
    mha = jnp.dot(attn.astype(cdt), wo_ref[...],
                  preferred_element_type=jnp.float32)

    # ---- residual + LayerNorm 0 (fused one-pass stats, f32) ----------------
    y = x_res + mha
    mu = jnp.mean(y, axis=-1, keepdims=True)
    var = jnp.mean(y * y, axis=-1, keepdims=True) - mu * mu
    y = (y - mu) * jax.lax.rsqrt(var + eps) * g1_ref[...] + b1_ref[...]

    # ---- FFN: Linear -> ReLU -> Linear (dropout = identity) ----------------
    h1 = jnp.maximum(
        jnp.dot(y.astype(cdt), w1_ref[...], preferred_element_type=jnp.float32), 0.0)
    ff = jnp.dot(h1.astype(cdt), w2_ref[...], preferred_element_type=jnp.float32)

    # ---- residual + LayerNorm 1 (fused one-pass stats, f32) ----------------
    z = y + ff
    mu2 = jnp.mean(z, axis=-1, keepdims=True)
    var2 = jnp.mean(z * z, axis=-1, keepdims=True) - mu2 * mu2
    z = (z - mu2) * jax.lax.rsqrt(var2 + eps) * g2_ref[...] + b2_ref[...]

    o_ref[0] = z.astype(o_ref.dtype)


def encoder_layer(x, params, *, n_head, tile_q=None, mxu_dtype=jnp.bfloat16):
    """One EncoderLayer forward.  x: (B, S, D) f32.  params in PyTorch (out,in) layout."""
    B, S, D = x.shape
    d_ff = params["w1"].shape[0]
    d_head = D // n_head
    assert n_head * d_head == D
    if tile_q is None:
        tile_q = S
        for cand in (256, 128, 64, 32, 16, 8):   # large MXU-friendly query tiles
            if S >= cand and S % cand == 0:
                tile_q = cand
                break
    assert S % tile_q == 0
    n_q = S // tile_q
    scale = float(d_head) ** -0.5
    cdt = mxu_dtype
    itemsize = jnp.dtype(cdt).itemsize

    # Pre-transpose Linear weights to (in, out); fold the attention scale into Wq.
    wq = (params["wq"].T * scale).astype(cdt)
    wk = params["wk"].T.astype(cdt)
    wv = params["wv"].T.astype(cdt)
    wo = params["wo"].T.astype(cdt)
    w1 = params["w1"].T.astype(cdt)      # (D, d_ff)
    w2 = params["w2"].T.astype(cdt)      # (d_ff, D)
    g1 = params["g1"].reshape(1, D).astype(jnp.float32)
    b1 = params["b1"].reshape(1, D).astype(jnp.float32)
    g2 = params["g2"].reshape(1, D).astype(jnp.float32)
    b2 = params["b2"].reshape(1, D).astype(jnp.float32)

    # Advisory cost estimate (activations read once, written once; weights once).
    flops = 2 * B * S * (4 * D * D + 2 * D * d_ff) + 4 * B * S * S * D
    transcendentals = B * n_head * S * S
    w_bytes = (4 * D * D + 2 * D * d_ff) * itemsize
    bytes_accessed = 2 * B * S * D * 4 + w_bytes + 4 * D * 4
    cost = pl.CostEstimate(flops=int(flops), transcendentals=int(transcendentals),
                           bytes_accessed=int(bytes_accessed))

    # Physical VMEM cap (v5e/v6e: 128 MiB, v7x: 64 MiB); keep 15% headroom.
    try:
        vmem_cap = int(pltpu.get_tpu_info().vmem_capacity_bytes)
    except Exception:
        vmem_cap = 64 * 1024 * 1024
    vmem_cap_usable = int(vmem_cap * 0.85)

    def run(single_buffer_weights):
        def wspec(shape):
            if single_buffer_weights:
                # grid-invariant weights: no double-buffering -> half the VMEM.
                return pl.BlockSpec(shape, lambda b, q: (0,) * len(shape),
                                    pipeline_mode=pl.Buffered(1))
            return pl.BlockSpec(shape, lambda b, q: (0,) * len(shape))

        # Explicit scoped-VMEM budget from the real block footprint (+ headroom).
        w_buf = 1 if single_buffer_weights else 2
        vmem_needed = (
            w_bytes * w_buf
            + (S * D + tile_q * D) * 4 * 2                      # x_full in + out tile (dbl-buf, f32)
            + 2 * n_head * d_head * S * itemsize                # K/V scratch (lane-dense)
            + 2 * n_head * tile_q * S * 4                       # scores + probs (f32)
            + tile_q * d_ff * 4                                 # FFN intermediate h1
            + 4 * D * 4 * 2)                                    # LayerNorm params
        vmem_limit = int(min(max(vmem_needed * 5 // 4, 32 * 1024 * 1024),
                             vmem_cap_usable))

        return pl.pallas_call(
            encoder_layer_kernel,
            out_shape=jax.ShapeDtypeStruct((B, S, D), x.dtype),
            grid_spec=pltpu.PrefetchScalarGridSpec(
                num_scalar_prefetch=0,
                grid=(B, n_q),
                in_specs=[
                    pl.BlockSpec((1, S, D), lambda b, q: (b, 0, 0)),   # x (full seq)
                    wspec((D, D)), wspec((D, D)), wspec((D, D)), wspec((D, D)),
                    wspec((D, d_ff)), wspec((d_ff, D)),
                    wspec((1, D)), wspec((1, D)), wspec((1, D)), wspec((1, D)),
                ],
                out_specs=pl.BlockSpec((1, tile_q, D), lambda b, q: (b, q, 0)),
                scratch_shapes=[
                    pltpu.VMEM((n_head, d_head, S), cdt),   # K, lane-dense (H, dh, S)
                    pltpu.VMEM((n_head, d_head, S), cdt),   # V, lane-dense (H, dh, S)
                ],
            ),
            compiler_params=pltpu.CompilerParams(
                dimension_semantics=("parallel", "arbitrary"),
                vmem_limit_bytes=vmem_limit),
            cost_estimate=cost,
        )(x, wq, wk, wv, wo, w1, w2, g1, b1, g2, b2)

    try:
        return run(single_buffer_weights=True)
    except Exception as e:  # only fall back on buffering-related lowering issues
        msg = str(e).lower()
        if isinstance(e, NotImplementedError) or "buffer" in msg or "pipeline_mode" in msg:
            return run(single_buffer_weights=False)
        raise


def encoder(x, layer_params, *, n_head, tile_q=None, mxu_dtype=jnp.bfloat16):
    out = x
    for p in layer_params:
        out = encoder_layer(out, p, n_head=n_head, tile_q=tile_q, mxu_dtype=mxu_dtype)
    return out


# ---------------------------- pure-JAX reference ----------------------------
def encoder_layer_ref(x, params, *, n_head):
    B, S, D = x.shape
    d_head = D // n_head
    scale = d_head ** -0.5
    eps = 1e-5
    lin = lambda a, w: a @ w.T  # PyTorch Linear, bias=False

    q = lin(x, params["wq"]).reshape(B, S, n_head, d_head).transpose(0, 2, 1, 3)
    k = lin(x, params["wk"]).reshape(B, S, n_head, d_head).transpose(0, 2, 1, 3)
    v = lin(x, params["wv"]).reshape(B, S, n_head, d_head).transpose(0, 2, 1, 3)
    s = jnp.einsum("bhqd,bhkd->bhqk", q * scale, k)
    p = jax.nn.softmax(s, axis=-1)
    o = jnp.einsum("bhqk,bhkd->bhqd", p, v).transpose(0, 2, 1, 3).reshape(B, S, D)
    mha = lin(o, params["wo"])

    def ln(a, g, b):
        mu = jnp.mean(a, axis=-1, keepdims=True)
        var = jnp.mean((a - mu) ** 2, axis=-1, keepdims=True)
        return (a - mu) * jax.lax.rsqrt(var + eps) * g + b

    y = ln(x + mha, params["g1"], params["b1"])
    ff = lin(jnp.maximum(lin(y, params["w1"]), 0.0), params["w2"])
    return ln(y + ff, params["g2"], params["b2"])


def encoder_ref(x, layer_params, *, n_head):
    out = x
    for p in layer_params:
        out = encoder_layer_ref(out, p, n_head=n_head)
    return out


if __name__ == "__main__":
    B, S, D, H, DFF, NLAYER, TQ = 2, 16, 128, 4, 256, 2, 8

    key = jax.random.PRNGKey(0)
    ks = jax.random.split(key, NLAYER * 6 + 1)
    init = lambda k, shape: jax.random.normal(k, shape, jnp.float32) * 0.05

    layer_params = []
    for layer in range(NLAYER):
        kk = ks[layer * 6:(layer + 1) * 6]
        layer_params.append({
            "wq": init(kk[0], (D, D)),      # PyTorch (out, in) layout
            "wk": init(kk[1], (D, D)),
            "wv": init(kk[2], (D, D)),
            "wo": init(kk[3], (D, D)),
            "w1": init(kk[4], (DFF, D)),
            "w2": init(kk[5], (D, DFF)),
            "g1": jnp.ones((D,), jnp.float32),
            "b1": jnp.zeros((D,), jnp.float32),
            "g2": jnp.ones((D,), jnp.float32),
            "b2": jnp.zeros((D,), jnp.float32),
        })
    x = jax.random.normal(ks[-1], (B, S, D), jnp.float32)

    ref = encoder_ref(x, layer_params, n_head=H)

    # f32 MXU operands: tight check (only approx-reciprocal softmax deviates).
    out_f32 = jax.block_until_ready(
        encoder(x, layer_params, n_head=H, tile_q=TQ, mxu_dtype=jnp.float32))
    assert out_f32.shape == (B, S, D)
    err_f32 = float(jnp.max(jnp.abs(out_f32 - ref)))
    assert jnp.allclose(out_f32, ref, atol=1e-2, rtol=1e-2), err_f32

    # bf16 MXU operands (default; f32 accumulation, f32 LN/softmax): looser check.
    out_bf16 = jax.block_until_ready(
        encoder(x, layer_params, n_head=H, tile_q=TQ))
    err_bf16 = float(jnp.max(jnp.abs(out_bf16 - ref)))
    assert jnp.allclose(out_bf16, ref, atol=1e-1, rtol=1e-1), err_bf16

    print("KERNEL_OK")
</pallas_src>

<mosaic_0001>
module attributes {stable_mosaic.version = 11 : i64} {
  func.func @encoder_layer_kernel(%arg0: i32, %arg1: i32, %arg2: memref<1x16x128xf32, #tpu.memory_space<vmem>>, %arg3: memref<128x128xf32, #tpu.memory_space<vmem>>, %arg4: memref<128x128xf32, #tpu.memory_space<vmem>>, %arg5: memref<128x128xf32, #tpu.memory_space<vmem>>, %arg6: memref<128x128xf32, #tpu.memory_space<vmem>>, %arg7: memref<128x256xf32, #tpu.memory_space<vmem>>, %arg8: memref<256x128xf32, #tpu.memory_space<vmem>>, %arg9: memref<1x128xf32, #tpu.memory_space<vmem>>, %arg10: memref<1x128xf32, #tpu.memory_space<vmem>>, %arg11: memref<1x128xf32, #tpu.memory_space<vmem>>, %arg12: memref<1x128xf32, #tpu.memory_space<vmem>>, %arg13: memref<1x8x128xf32, #tpu.memory_space<vmem>>, %arg14: memref<4x32x16xf32, #tpu.memory_space<vmem>>, %arg15: memref<4x32x16xf32, #tpu.memory_space<vmem>>) attributes {dimension_semantics = [#tpu.dimension_semantics<parallel>, #tpu.dimension_semantics<arbitrary>], iteration_bounds = array<i64: 2, 2>, scalar_prefetch = 0 : i64, scratch_operands = 2 : i64, tpu.core_type = #tpu.core_type<tc>, window_params = [{transform_indices = @transform_0, window_bounds = array<i64: 1, 16, 128>}, {pipeline_mode = #tpu.pipeline_mode<synchronous>, transform_indices = @transform_1, window_bounds = array<i64: 128, 128>}, {pipeline_mode = #tpu.pipeline_mode<synchronous>, transform_indices = @transform_2, window_bounds = array<i64: 128, 128>}, {pipeline_mode = #tpu.pipeline_mode<synchronous>, transform_indices = @transform_3, window_bounds = array<i64: 128, 128>}, {pipeline_mode = #tpu.pipeline_mode<synchronous>, transform_indices = @transform_4, window_bounds = array<i64: 128, 128>}, {pipeline_mode = #tpu.pipeline_mode<synchronous>, transform_indices = @transform_5, window_bounds = array<i64: 128, 256>}, {pipeline_mode = #tpu.pipeline_mode<synchronous>, transform_indices = @transform_6, window_bounds = array<i64: 256, 128>}, {pipeline_mode = #tpu.pipeline_mode<synchronous>, transform_indices = @transform_7, window_bounds = array<i64: 1, 128>}, {pipeline_mode = #tpu.pipeline_mode<synchronous>, transform_indices = @transform_8, window_bounds = array<i64: 1, 128>}, {pipeline_mode = #tpu.pipeline_mode<synchronous>, transform_indices = @transform_9, window_bounds = array<i64: 1, 128>}, {pipeline_mode = #tpu.pipeline_mode<synchronous>, transform_indices = @transform_10, window_bounds = array<i64: 1, 128>}, {transform_indices = @transform_11, window_bounds = array<i64: 1, 8, 128>}]} {
    %c0_i32 = arith.constant 0 : i32
    %0 = arith.cmpi eq, %arg1, %c0_i32 : i32
    %1 = arith.extui %0 : i1 to i32
    %c0_i32_0 = arith.constant 0 : i32
    %2 = arith.cmpi ne, %1, %c0_i32_0 : i32
    scf.if %2 {
      %c0_45 = arith.constant 0 : index
      %c0_46 = arith.constant 0 : index
      %c0_47 = arith.constant 0 : index
      %89 = vector.load %arg2[%c0_45, %c0_46, %c0_47] : memref<1x16x128xf32, #tpu.memory_space<vmem>>, vector<1x16x128xf32>
      %90 = vector.shape_cast %89 : vector<1x16x128xf32> to vector<16x128xf32>
      %c0_48 = arith.constant 0 : index
      %c0_49 = arith.constant 0 : index
      %91 = vector.load %arg4[%c0_48, %c0_49] : memref<128x128xf32, #tpu.memory_space<vmem>>, vector<128x128xf32>
      %cst_50 = arith.constant dense<0.000000e+00> : vector<16x128xf32>
      %92 = tpu.matmul %90, %91, %cst_50 {dimension_numbers = #tpu.dot_dimension_numbers<[1], [0], [0], [1], [0, 0, 1, 1], [], []>} : vector<16x128xf32>, vector<128x128xf32>, vector<16x128xf32> -> vector<16x128xf32>
      %c0_51 = arith.constant 0 : index
      %c0_52 = arith.constant 0 : index
      %93 = vector.load %arg5[%c0_51, %c0_52] : memref<128x128xf32, #tpu.memory_space<vmem>>, vector<128x128xf32>
      %cst_53 = arith.constant dense<0.000000e+00> : vector<16x128xf32>
      %94 = tpu.matmul %90, %93, %cst_53 {dimension_numbers = #tpu.dot_dimension_numbers<[1], [0], [0], [1], [0, 0, 1, 1], [], []>} : vector<16x128xf32>, vector<128x128xf32>, vector<16x128xf32> -> vector<16x128xf32>
      %95 = vector.shape_cast %92 : vector<16x128xf32> to vector<16x4x32xf32>
      %96 = tpu.transpose %95, [1, 0, 2] : vector<16x4x32xf32> -> vector<4x16x32xf32>
      %97 = vector.shape_cast %94 : vector<16x128xf32> to vector<16x4x32xf32>
      %98 = tpu.transpose %97, [1, 0, 2] : vector<16x4x32xf32> -> vector<4x16x32xf32>
      %99 = tpu.transpose %96, [0, 2, 1] : vector<4x16x32xf32> -> vector<4x32x16xf32>
      %c0_54 = arith.constant 0 : index
      %c0_55 = arith.constant 0 : index
      %c0_56 = arith.constant 0 : index
      %100 = vector.load %arg14[%c0_54, %c0_55, %c0_56] : memref<4x32x16xf32, #tpu.memory_space<vmem>>, vector<4x32x16xf32>
      tpu.vector_store %arg14[%c0_54, %c0_55, %c0_56], %99 {strides = array<i32>} : memref<4x32x16xf32, #tpu.memory_space<vmem>>, vector<4x32x16xf32>,
      %101 = tpu.transpose %98, [0, 2, 1] : vector<4x16x32xf32> -> vector<4x32x16xf32>
      %c0_57 = arith.constant 0 : index
      %c0_58 = arith.constant 0 : index
      %c0_59 = arith.constant 0 : index
      %102 = vector.load %arg15[%c0_57, %c0_58, %c0_59] : memref<4x32x16xf32, #tpu.memory_space<vmem>>, vector<4x32x16xf32>
      tpu.vector_store %arg15[%c0_57, %c0_58, %c0_59], %101 {strides = array<i32>} : memref<4x32x16xf32, #tpu.memory_space<vmem>>, vector<4x32x16xf32>,
    } else {
    }
    %c8_i32 = arith.constant 8 : i32
    %3 = arith.muli %arg1, %c8_i32 : i32
    %4 = tpu.assume_multiple %3, 8 : i32
    %c0 = arith.constant 0 : index
    %5 = arith.index_cast %4 : i32 to index
    %c0_1 = arith.constant 0 : index
    %6 = vector.load %arg2[%c0, %5, %c0_1] : memref<1x16x128xf32, #tpu.memory_space<vmem>>, vector<1x8x128xf32>
    %7 = vector.shape_cast %6 : vector<1x8x128xf32> to vector<8x128xf32>
    %c0_2 = arith.constant 0 : index
    %c0_3 = arith.constant 0 : index
    %8 = vector.load %arg3[%c0_2, %c0_3] : memref<128x128xf32, #tpu.memory_space<vmem>>, vector<128x128xf32>
    %cst = arith.constant dense<0.000000e+00> : vector<8x128xf32>
    %9 = tpu.matmul %7, %8, %cst {dimension_numbers = #tpu.dot_dimension_numbers<[1], [0], [0], [1], [0, 0, 1, 1], [], []>} : vector<8x128xf32>, vector<128x128xf32>, vector<8x128xf32> -> vector<8x128xf32>
    %10 = vector.shape_cast %9 : vector<8x128xf32> to vector<8x4x32xf32>
    %11 = tpu.transpose %10, [1, 0, 2] : vector<8x4x32xf32> -> vector<4x8x32xf32>
    %c0_4 = arith.constant 0 : index
    %c0_5 = arith.constant 0 : index
    %c0_6 = arith.constant 0 : index
    %12 = vector.load %arg14[%c0_4, %c0_5, %c0_6] : memref<4x32x16xf32, #tpu.memory_space<vmem>>, vector<4x32x16xf32>
    "tpu.trace_start"() <{level = 10 : i32, message = "hqd,hds->hqs"}> : () -> ()
    %cst_7 = arith.constant dense<0.000000e+00> : vector<4x8x16xf32>
    %13 = tpu.matmul %11, %12, %cst_7 {dimension_numbers = #tpu.dot_dimension_numbers<[2], [1], [1], [2], [0, 0, 0, 1, 1, 2], [0], [0]>} : vector<4x8x32xf32>, vector<4x32x16xf32>, vector<4x8x16xf32> -> vector<4x8x16xf32>
    "tpu.trace_stop"() : () -> ()
    %cst_8 = arith.constant dense<0xFF800000> : vector<4x8xf32>
    %14 = vector.multi_reduction <maximumf>, %13, %cst_8 [2] : vector<4x8x16xf32> to vector<4x8xf32>
    %15 = vector.shape_cast %14 : vector<4x8xf32> to vector<4x8x1xf32>
    %16 = vector.broadcast %15 : vector<4x8x1xf32> to vector<4x8x16xf32>
    %17 = arith.subf %13, %16 : vector<4x8x16xf32>
    %18 = math.exp %17 : vector<4x8x16xf32>
    %cst_9 = arith.constant dense<0.000000e+00> : vector<4x8xf32>
    %19 = vector.multi_reduction <add>, %18, %cst_9 [2] : vector<4x8x16xf32> to vector<4x8xf32>
    %20 = vector.shape_cast %19 : vector<4x8xf32> to vector<4x8x1xf32>
    %21 = tpu.reciprocal %20 {approx = true} : vector<4x8x1xf32> -> vector<4x8x1xf32>
    %22 = vector.broadcast %21 : vector<4x8x1xf32> to vector<4x8x16xf32>
    %23 = arith.mulf %18, %22 : vector<4x8x16xf32>
    %c0_10 = arith.constant 0 : index
    %c0_11 = arith.constant 0 : index
    %c0_12 = arith.constant 0 : index
    %24 = vector.load %arg15[%c0_10, %c0_11, %c0_12] : memref<4x32x16xf32, #tpu.memory_space<vmem>>, vector<4x32x16xf32>
    "tpu.trace_start"() <{level = 10 : i32, message = "hqs,hds->hqd"}> : () -> ()
    %cst_13 = arith.constant dense<0.000000e+00> : vector<4x8x32xf32>
    %25 = tpu.matmul %23, %24, %cst_13 {dimension_numbers = #tpu.dot_dimension_numbers<[2], [2], [1], [1], [0, 0, 0, 1, 1, 1], [0], [0]>} : vector<4x8x16xf32>, vector<4x32x16xf32>, vector<4x8x32xf32> -> vector<4x8x32xf32>
    "tpu.trace_stop"() : () -> ()
    %26 = tpu.transpose %25, [1, 0, 2] : vector<4x8x32xf32> -> vector<8x4x32xf32>
    %27 = vector.shape_cast %26 : vector<8x4x32xf32> to vector<8x128xf32>
    %c0_14 = arith.constant 0 : index
    %c0_15 = arith.constant 0 : index
    %28 = vector.load %arg6[%c0_14, %c0_15] : memref<128x128xf32, #tpu.memory_space<vmem>>, vector<128x128xf32>
    %cst_16 = arith.constant dense<0.000000e+00> : vector<8x128xf32>
    %29 = tpu.matmul %27, %28, %cst_16 {dimension_numbers = #tpu.dot_dimension_numbers<[1], [0], [0], [1], [0, 0, 1, 1], [], []>} : vector<8x128xf32>, vector<128x128xf32>, vector<8x128xf32> -> vector<8x128xf32>
    %30 = arith.addf %7, %29 : vector<8x128xf32>
    %cst_17 = arith.constant dense<0.000000e+00> : vector<8xf32>
    %31 = vector.multi_reduction <add>, %30, %cst_17 [1] : vector<8x128xf32> to vector<8xf32>
    %32 = vector.shape_cast %31 : vector<8xf32> to vector<8x1xf32>
    %cst_18 = arith.constant 1.280000e+02 : f32
    %33 = vector.broadcast %cst_18 : f32 to vector<8x1xf32>
    %34 = arith.divf %32, %33 : vector<8x1xf32>
    %35 = arith.mulf %30, %30 : vector<8x128xf32>
    %cst_19 = arith.constant dense<0.000000e+00> : vector<8xf32>
    %36 = vector.multi_reduction <add>, %35, %cst_19 [1] : vector<8x128xf32> to vector<8xf32>
    %37 = vector.shape_cast %36 : vector<8xf32> to vector<8x1xf32>
    %cst_20 = arith.constant 1.280000e+02 : f32
    %38 = vector.broadcast %cst_20 : f32 to vector<8x1xf32>
    %39 = arith.divf %37, %38 : vector<8x1xf32>
    %40 = arith.mulf %34, %34 : vector<8x1xf32>
    %41 = arith.subf %39, %40 : vector<8x1xf32>
    %42 = vector.broadcast %34 : vector<8x1xf32> to vector<8x128xf32>
    %43 = arith.subf %30, %42 : vector<8x128xf32>
    %cst_21 = arith.constant 9.99999974E-6 : f32
    %44 = vector.broadcast %cst_21 : f32 to vector<8x1xf32>
    %45 = arith.addf %41, %44 : vector<8x1xf32>
    %46 = math.rsqrt %45 : vector<8x1xf32>
    %47 = vector.broadcast %46 : vector<8x1xf32> to vector<8x128xf32>
    %48 = arith.mulf %43, %47 : vector<8x128xf32>
    %c0_22 = arith.constant 0 : index
    %c0_23 = arith.constant 0 : index
    %49 = vector.load %arg9[%c0_22, %c0_23] : memref<1x128xf32, #tpu.memory_space<vmem>>, vector<1x128xf32>
    %50 = vector.broadcast %49 : vector<1x128xf32> to vector<8x128xf32>
    %51 = arith.mulf %48, %50 : vector<8x128xf32>
    %c0_24 = arith.constant 0 : index
    %c0_25 = arith.constant 0 : index
    %52 = vector.load %arg10[%c0_24, %c0_25] : memref<1x128xf32, #tpu.memory_space<vmem>>, vector<1x128xf32>
    %53 = vector.broadcast %52 : vector<1x128xf32> to vector<8x128xf32>
    %54 = arith.addf %51, %53 : vector<8x128xf32>
    %c0_26 = arith.constant 0 : index
    %c0_27 = arith.constant 0 : index
    %55 = vector.load %arg7[%c0_26, %c0_27] : memref<128x256xf32, #tpu.memory_space<vmem>>, vector<128x256xf32>
    %cst_28 = arith.constant dense<0.000000e+00> : vector<8x256xf32>
    %56 = tpu.matmul %54, %55, %cst_28 {dimension_numbers = #tpu.dot_dimension_numbers<[1], [0], [0], [1], [0, 0, 1, 1], [], []>} : vector<8x128xf32>, vector<128x256xf32>, vector<8x256xf32> -> vector<8x256xf32>
    %cst_29 = arith.constant 0.000000e+00 : f32
    %57 = vector.broadcast %cst_29 : f32 to vector<8x256xf32>
    %58 = arith.maximumf %56, %57 : vector<8x256xf32>
    %c0_30 = arith.constant 0 : index
    %c0_31 = arith.constant 0 : index
    %59 = vector.load %arg8[%c0_30, %c0_31] : memref<256x128xf32, #tpu.memory_space<vmem>>, vector<256x128xf32>
    %cst_32 = arith.constant dense<0.000000e+00> : vector<8x128xf32>
    %60 = tpu.matmul %58, %59, %cst_32 {dimension_numbers = #tpu.dot_dimension_numbers<[1], [0], [0], [1], [0, 0, 1, 1], [], []>} : vector<8x256xf32>, vector<256x128xf32>, vector<8x128xf32> -> vector<8x128xf32>
    %61 = arith.addf %54, %60 : vector<8x128xf32>
    %cst_33 = arith.constant dense<0.000000e+00> : vector<8xf32>
    %62 = vector.multi_reduction <add>, %61, %cst_33 [1] : vector<8x128xf32> to vector<8xf32>
    %63 = vector.shape_cast %62 : vector<8xf32> to vector<8x1xf32>
    %cst_34 = arith.constant 1.280000e+02 : f32
    %64 = vector.broadcast %cst_34 : f32 to vector<8x1xf32>
    %65 = arith.divf %63, %64 : vector<8x1xf32>
    %66 = arith.mulf %61, %61 : vector<8x128xf32>
    %cst_35 = arith.constant dense<0.000000e+00> : vector<8xf32>
    %67 = vector.multi_reduction <add>, %66, %cst_35 [1] : vector<8x128xf32> to vector<8xf32>
    %68 = vector.shape_cast %67 : vector<8xf32> to vector<8x1xf32>
    %cst_36 = arith.constant 1.280000e+02 : f32
    %69 = vector.broadcast %cst_36 : f32 to vector<8x1xf32>
    %70 = arith.divf %68, %69 : vector<8x1xf32>
    %71 = arith.mulf %65, %65 : vector<8x1xf32>
    %72 = arith.subf %70, %71 : vector<8x1xf32>
    %73 = vector.broadcast %65 : vector<8x1xf32> to vector<8x128xf32>
    %74 = arith.subf %61, %73 : vector<8x128xf32>
    %cst_37 = arith.constant 9.99999974E-6 : f32
    %75 = vector.broadcast %cst_37 : f32 to vector<8x1xf32>
    %76 = arith.addf %72, %75 : vector<8x1xf32>
    %77 = math.rsqrt %76 : vector<8x1xf32>
    %78 = vector.broadcast %77 : vector<8x1xf32> to vector<8x128xf32>
    %79 = arith.mulf %74, %78 : vector<8x128xf32>
    %c0_38 = arith.constant 0 : index
    %c0_39 = arith.constant 0 : index
    %80 = vector.load %arg11[%c0_38, %c0_39] : memref<1x128xf32, #tpu.memory_space<vmem>>, vector<1x128xf32>
    %81 = vector.broadcast %80 : vector<1x128xf32> to vector<8x128xf32>
    %82 = arith.mulf %79, %81 : vector<8x128xf32>
    %c0_40 = arith.constant 0 : index
    %c0_41 = arith.constant 0 : index
    %83 = vector.load %arg12[%c0_40, %c0_41] : memref<1x128xf32, #tpu.memory_space<vmem>>, vector<1x128xf32>
    %84 = vector.broadcast %83 : vector<1x128xf32> to vector<8x128xf32>
    %85 = arith.addf %82, %84 : vector<8x128xf32>
    %c0_42 = arith.constant 0 : index
    %c0_43 = arith.constant 0 : index
    %c0_44 = arith.constant 0 : index
    %86 = vector.load %arg13[%c0_42, %c0_43, %c0_44] : memref<1x8x128xf32, #tpu.memory_space<vmem>>, vector<1x8x128xf32>
    %87 = vector.shape_cast %86 : vector<1x8x128xf32> to vector<8x128xf32>
    %88 = vector.shape_cast %85 : vector<8x128xf32> to vector<1x8x128xf32>
    tpu.vector_store %arg13[%c0_42, %c0_43, %c0_44], %88 {strides = array<i32>} : memref<1x8x128xf32, #tpu.memory_space<vmem>>, vector<1x8x128xf32>,
    return
  }
  func.func @transform_0(%arg0: i32, %arg1: i32) -> (i32, i32, i32) {
    %c0_i32 = arith.constant 0 : i32
    %c0_i32_0 = arith.constant 0 : i32
    %c0_i32_1 = arith.constant 0 : i32
    return %arg0, %c0_i32, %c0_i32_0 : i32, i32, i32
  }
  func.func @transform_1(%arg0: i32, %arg1: i32) -> (i32, i32) {
    %c0_i32 = arith.constant 0 : i32
    %c0_i32_0 = arith.constant 0 : i32
    %c0_i32_1 = arith.constant 0 : i32
    return %c0_i32, %c0_i32_0 : i32, i32
  }
  func.func @transform_2(%arg0: i32, %arg1: i32) -> (i32, i32) {
    %c0_i32 = arith.constant 0 : i32
    %c0_i32_0 = arith.constant 0 : i32
    %c0_i32_1 = arith.constant 0 : i32
    return %c0_i32, %c0_i32_0 : i32, i32
  }
  func.func @transform_3(%arg0: i32, %arg1: i32) -> (i32, i32) {
    %c0_i32 = arith.constant 0 : i32
    %c0_i32_0 = arith.constant 0 : i32
    %c0_i32_1 = arith.constant 0 : i32
    return %c0_i32, %c0_i32_0 : i32, i32
  }
  func.func @transform_4(%arg0: i32, %arg1: i32) -> (i32, i32) {
    %c0_i32 = arith.constant 0 : i32
    %c0_i32_0 = arith.constant 0 : i32
    %c0_i32_1 = arith.constant 0 : i32
    return %c0_i32, %c0_i32_0 : i32, i32
  }
  func.func @transform_5(%arg0: i32, %arg1: i32) -> (i32, i32) {
    %c0_i32 = arith.constant 0 : i32
    %c0_i32_0 = arith.constant 0 : i32
    %c0_i32_1 = arith.constant 0 : i32
    return %c0_i32, %c0_i32_0 : i32, i32
  }
  func.func @transform_6(%arg0: i32, %arg1: i32) -> (i32, i32) {
    %c0_i32 = arith.constant 0 : i32
    %c0_i32_0 = arith.constant 0 : i32
    %c0_i32_1 = arith.constant 0 : i32
    return %c0_i32, %c0_i32_0 : i32, i32
  }
  func.func @transform_7(%arg0: i32, %arg1: i32) -> (i32, i32) {
    %c0_i32 = arith.constant 0 : i32
    %c0_i32_0 = arith.constant 0 : i32
    %c0_i32_1 = arith.constant 0 : i32
    return %c0_i32, %c0_i32_0 : i32, i32
  }
  func.func @transform_8(%arg0: i32, %arg1: i32) -> (i32, i32) {
    %c0_i32 = arith.constant 0 : i32
    %c0_i32_0 = arith.constant 0 : i32
    %c0_i32_1 = arith.constant 0 : i32
    return %c0_i32, %c0_i32_0 : i32, i32
  }
  func.func @transform_9(%arg0: i32, %arg1: i32) -> (i32, i32) {
    %c0_i32 = arith.constant 0 : i32
    %c0_i32_0 = arith.constant 0 : i32
    %c0_i32_1 = arith.constant 0 : i32
    return %c0_i32, %c0_i32_0 : i32, i32
  }
  func.func @transform_10(%arg0: i32, %arg1: i32) -> (i32, i32) {
    %c0_i32 = arith.constant 0 : i32
    %c0_i32_0 = arith.constant 0 : i32
    %c0_i32_1 = arith.constant 0 : i32
    return %c0_i32, %c0_i32_0 : i32, i32
  }
  func.func @transform_11(%arg0: i32, %arg1: i32) -> (i32, i32, i32) {
    %c0_i32 = arith.constant 0 : i32
    %c0_i32_0 = arith.constant 0 : i32
    return %arg0, %arg1, %c0_i32 : i32, i32, i32
  }
}

</mosaic_0001>

<bundles_post_ra>
// kernel: tpu_custom_call.1
= control target key start
LH: loop header
LB: loop body
LE: loop exit
PB: predicated region body
PF: predicated region fallthrough
CT: control target
= control target key end

     0   :  { %s5199_s0 = inlined_call_operand.hbm [shape: f32[2,16,128], index: 0, kind: input, shape index: {}]   ;;  %s5200_s1 = inlined_call_operand.hbm [shape: f32[128,128], index: 1, kind: input, shape index: {}]   ;;  %s5201_s2 = inlined_call_operand.hbm [shape: f32[128,128], index: 2, kind: input, shape index: {}]   ;;  %s5202_s3 = inlined_call_operand.hbm [shape: f32[128,128], index: 3, kind: input, shape index: {}]   ;;  %s5203_s4 = inlined_call_operand.hbm [shape: f32[128,128], index: 4, kind: input, shape index: {}]   ;;  %s5204_s5 = inlined_call_operand.hbm [shape: f32[128,256], index: 5, kind: input, shape index: {}]   ;;  %s5205_s6 = inlined_call_operand.hbm [shape: f32[256,128], index: 6, kind: input, shape index: {}]   ;;  %s5206_s7 = inlined_call_operand.vmem [shape: f32[1,128], index: 7, kind: input, shape index: {}]   ;;  %s5207_s8 = inlined_call_operand.vmem [shape: f32[1,128], index: 8, kind: input, shape index: {}]   ;;  %s5208_s9 = inlined_call_operand.vmem [shape: f32[1,128], index: 9, kind: input, shape index: {}]   ;;  %s5209_s10 = inlined_call_operand.vmem [shape: f32[1,128], index: 10, kind: input, shape index: {}]   ;;  %s5210_s11 = inlined_call_operand.hbm [shape: f32[2,16,128], index: 11, kind: output, shape index: {}]  }
   0x1   :  { %5226 = sst [smem:[#allocation27_spill]] %s5199_s0 }
   0x2   :  { %5227 = sst [smem:[#allocation28_spill]] %s5200_s1 }
   0x3   :  { %5228 = sst [smem:[#allocation29_spill]] %s5201_s2 }
   0x4   :  { %5229 = sst [smem:[#allocation30_spill]] %s5202_s3 }
   0x5   :  { %5230 = sst [smem:[#allocation31_spill]] %s5203_s4 }
   0x6   :  { %5231 = sst [smem:[#allocation32_spill]] %s5204_s5 }
   0x7   :  { %5232 = sst [smem:[#allocation33_spill]] %s5206_s7 }
   0x8   :  { %5233 = sst [smem:[#allocation34_spill]] %s5207_s8 }
   0x9   :  { %5234 = sst [smem:[#allocation35_spill]] %s5208_s9 }
   0xa   :  { %5235 = sst [smem:[#allocation36_spill]] %s5209_s10 }
   0xb   :  { %5236 = sst [smem:[#allocation37_spill]] %s5210_s11 }
   0xc   :  { %16 = vsyncpa [#allocation5], 0 }
   0xd   :  { %18 = vsyncpa [#allocation5 + $0x1], 0 }
   0xe   :  { %19 = vsyncpa [#allocation8], 0 }
   0xf   :  { %20 = vsyncpa [#allocation11], 0 }
  0x10   :  { %21 = vsyncpa [#allocation14], 0 }
  0x11   :  { %22 = vsyncpa [#allocation6], 0 }
  0x12   :  { %24 = vsyncpa [#allocation6 + $0x1], 0  ;;  %s4473_s17 = smov 0   ;;  %s4475_s18 = smov 0  }
  0x13   :  { %s4477_s19 = smov 0   ;;  %s4479_s20 = smov 0  }
  0x14   :  { %s4481_s21 = smov 0   ;;  %s4483_s22 = smov 0  }
  0x15   :  { %s4485_s23 = smov 0   ;;  %s4487_s24 = smov 0  }
  0x16   :  { %s4489_s25 = smov 0   ;;  %s4491_s26 = smov 0  }
  0x17   :  { %s4493_s27 = smov 0  }
  0x18 LB: > { %5237 = sst [smem:[#allocation22_spill]] %s4346_s17  ;;  %s3178_s28 = sadd.s32 4294967295, %s4386_s27   ;;  %s4386_s27 = sphi %s4493_s27, %s30_s27   ;;  %s4382_s26 = sphi %s4491_s26, %s5291_s26   ;;  %s4378_s25 = sphi %s4489_s25, %s5290_s25   ;;  %s4374_s24 = sphi %s4487_s24, %s5289_s24   ;;  %s4370_s23 = sphi %s4485_s23, %s5288_s23   ;;  %s4366_s22 = sphi %s4483_s22, %s5287_s22   ;;  %s4362_s21 = sphi %s4481_s21, %s5286_s21   ;;  %s4358_s20 = sphi %s4479_s20, %s5285_s20   ;;  %s4354_s19 = sphi %s4477_s19, %s5284_s19   ;;  %s4350_s18 = sphi %s4475_s18, %s5283_s18   ;;  %s4346_s17 = sphi %s4473_s17, %s5282_s17  }
  0x19   : > { %5238 = sst [smem:[#allocation23_spill]] %s4370_s23  ;;  %p3180_p0 = scmp.ge.s32.totalorder %s4386_s27, 1 }
  0x1a   : > { %5239 = sst [smem:[#allocation24_spill]] %s4374_s24  ;;  %p4530_p1 = scmp.eq.s32.totalorder %s3178_s28, 0 }
  0x1b   : > { %p4534_p2 = scmp.eq.s32.totalorder %s3178_s28, 3  ;;  %p311_p3 = scmp.lt.s32.totalorder %s4386_s27, 5 }
  0x1c   : > { %s5240_s29 = scalar_select %p4530_p1, 1, 0 }
  0x1d   : > { %s5241_s30 = scalar_select %p4534_p2, 1, 0 }
  0x1e   : > { %p4539_p4 = pnand %p3180_p0, %p311_p3  ;;  %s4388_s13 = smov [#allocation7]  }
  0x1f   : > { %5242 = sst [smem:[#allocation25_spill]] %s5241_s30  ;;  %s323_s14 = sshll.u32 %s4388_s13, 4  ;;  %s4543_s14 = int_to_ptr.vmem [resolvable:$true] %s323_s14 }
  0x20   : > { %s5243_s12 = scalar_select %p4539_p4, 1, 0 }
  0x21   : > { %p3881_p5 = pneg %p4539_p4  ;;  %s4389_s16 = smov [#allocation10]  }
  0x22   : > { %5244 = sst [smem:[#allocation26_spill]] %s5243_s12  ;;  %s349_s28 = sshll.u32 %s4389_s16, 4  ;;  %s4553_s28 = int_to_ptr.vmem [resolvable:$true] %s349_s28 }
  0x23   : > { %p4549_p6 = pnand %p3881_p5, %p4530_p1  ;;  %s4390_s11 = smov [#allocation13]  }
  0x24   : > { %s375_s10 = sshll.u32 %s4390_s11, 4  ;;  %s5246_s1 = sld [smem:[#allocation28_spill]]  ;;  %s4555_s10 = int_to_ptr.vmem [resolvable:$true] %s375_s10 }
  0x25   : > { %p4565_p8 = pneg %p4549_p6 }
  0x2a   : > { %s4054_s24 = scalar_lea.hbm %s5246_s1, 2048 }
  0x2b   : > { %p4055_p7 = scmp.ne.s32.totalorder %s5246_s1, %s4054_s24  ;;  %p4061_p11 = scmp.lt.u32.totalorder %s4054_s24, %s5246_s1 }
  0x2d   : > { %p4057_p9 = pnand %p4565_p8, %p4055_p7 }
  0x2f   : > { %p4058_p10 = pneg %p4057_p9 }
  0x31   : > { %p4063_p12 = pnand %p4061_p11, %p4058_p10 }
  0x33   : > { %4066 = shalt.err (!%p4063_p12)
}
  0x34   : > { %s4067_s7 = scalar_lea.vmem %s4543_s14, 2048  ;;  %p4075_p5 = scmp.lt.s32.totalorder %s4543_s14, %s4543_s14 }
  0x35   : > { %p4068_p13 = scmp.ne.s32.totalorder %s4543_s14, %s4067_s7  ;;  %p4076_p4 = scmp.lt.s32.totalorder %s4067_s7, %s4067_s7 }
  0x37   : > { %p4070_p0 = pnand %p4068_p13, %p4565_p8  ;;  %p4077_p7 = por %p4076_p4, %p4075_p5 }
  0x39   : > { %p4071_p3 = pneg %p4070_p0 }
  0x3b   : > { %p4078_p9 = pnand %p4077_p7, %p4071_p3 }
  0x3d   : > { %4081 = shalt.err (!%p4078_p9)
}
  0x3e   : > { %s5217_s8 = smov 128   ;;  %s5219_s9 = smov 8  }
  0x3f   : > { %3884 = dma.hbm_to_vmem [thread:$0]  (!%p4549_p6), %s5246_s1, 2048, %s4543_s14, [#allocation8], %s5217_s8, %s5217_s8, %s5219_s9  }
  0x40   : > { %s5248_s3 = sld [smem:[#allocation30_spill]] }
  0x46   : > { %s4082_s7 = scalar_lea.hbm %s5248_s3, 2048 }
  0x47   : > { %p4083_p4 = scmp.ne.s32.totalorder %s5248_s3, %s4082_s7  ;;  %p4089_p12 = scmp.lt.u32.totalorder %s4082_s7, %s5248_s3 }
  0x49   : > { %p4085_p10 = pnand %p4083_p4, %p4565_p8 }
  0x4b   : > { %p4086_p11 = pneg %p4085_p10 }
  0x4d   : > { %p4091_p13 = pnand %p4089_p12, %p4086_p11 }
  0x4f   : > { %4094 = shalt.err (!%p4091_p13)
}
  0x50   : > { %s4095_s14 = scalar_lea.vmem %s4553_s28, 2048  ;;  %p4103_p7 = scmp.lt.s32.totalorder %s4553_s28, %s4553_s28 }
  0x51   : > { %p4096_p0 = scmp.ne.s32.totalorder %s4553_s28, %s4095_s14  ;;  %p4104_p9 = scmp.lt.s32.totalorder %s4095_s14, %s4095_s14 }
  0x53   : > { %p4098_p3 = pnand %p4096_p0, %p4565_p8  ;;  %p4105_p4 = por %p4104_p9, %p4103_p7 }
  0x55   : > { %p4099_p5 = pneg %p4098_p3 }
  0x57   : > { %p4106_p10 = pnand %p4105_p4, %p4099_p5 }
  0x59   : > { %4109 = shalt.err (!%p4106_p10)
}
  0x5a   : > { %3890 = dma.hbm_to_vmem [thread:$0]  (!%p4549_p6), %s5248_s3, 2048, %s4553_s28, [#allocation11], %s5217_s8, %s5217_s8, %s5219_s9  }
  0x5b   : > { %s5249_s5 = sld [smem:[#allocation32_spill]] }
  0x61   : > { %s4110_s24 = scalar_lea.hbm %s5249_s5, 4096 }
  0x62   : > { %p4111_p11 = scmp.ne.s32.totalorder %s5249_s5, %s4110_s24  ;;  %p4117_p0 = scmp.lt.u32.totalorder %s4110_s24, %s5249_s5 }
  0x64   : > { %p4113_p12 = pnand %p4111_p11, %p4565_p8 }
  0x66   : > { %p4114_p13 = pneg %p4113_p12 }
  0x68   : > { %p4119_p3 = pnand %p4117_p0, %p4114_p13 }
  0x6a   : > { %4122 = shalt.err (!%p4119_p3)
}
  0x6b   : > { %s4123_s28 = scalar_lea.vmem %s4555_s10, 4096  ;;  %p4131_p4 = scmp.lt.s32.totalorder %s4555_s10, %s4555_s10 }
  0x6c   : > { %p4124_p5 = scmp.ne.s32.totalorder %s4555_s10, %s4123_s28  ;;  %p4132_p10 = scmp.lt.s32.totalorder %s4123_s28, %s4123_s28 }
  0x6e   : > { %p4126_p7 = pnand %p4124_p5, %p4565_p8  ;;  %p4133_p11 = por %p4132_p10, %p4131_p4 }
  0x70   : > { %p4127_p9 = pneg %p4126_p7 }
  0x72   : > { %p4134_p12 = pnand %p4133_p11, %p4127_p9 }
  0x74   : > { %4137 = shalt.err (!%p4134_p12)
}
  0x75   : > { %s4393_s14 = smov 256   ;;  %s4394_s0 = smov 16  }
  0x76   : > { %3896 = dma.hbm_to_vmem [thread:$0]  (!%p4549_p6), %s5249_s5, 4096, %s4555_s10, [#allocation14], %s4393_s14, %s4393_s14, %s4394_s0  }
  0x77   : > { %s4395_s12 = smov [#allocation9]   ;;  %s4396_s13 = smov [#allocation12]  }
  0x78   : > { %s336_s24 = sshll.u32 %s4395_s12, 4  ;;  %s362_s11 = sshll.u32 %s4396_s13, 4  ;;  %s337_s24 = int_to_ptr.vmem [resolvable:$true] %s336_s24  ;;  %s4638_s11 = int_to_ptr.vmem [resolvable:$true] %s362_s11 }
  0x79   : > { %s5250_s2 = sld [smem:[#allocation29_spill]] }
  0x7f   : > { %s4138_s28 = scalar_lea.hbm %s5250_s2, 2048 }
  0x80   : > { %p4139_p13 = scmp.ne.s32.totalorder %s5250_s2, %s4138_s28  ;;  %p4145_p5 = scmp.lt.u32.totalorder %s4138_s28, %s5250_s2 }
  0x82   : > { %p4141_p0 = pnand %p4139_p13, %p4565_p8 }
  0x84   : > { %p4142_p3 = pneg %p4141_p0 }
  0x86   : > { %p4147_p7 = pnand %p4145_p5, %p4142_p3 }
  0x88   : > { %4150 = shalt.err (!%p4147_p7)
}
  0x89   : > { %s4151_s14 = scalar_lea.vmem %s337_s24, 2048  ;;  %p4159_p11 = scmp.lt.s32.totalorder %s337_s24, %s337_s24 }
  0x8a   : > { %p4152_p9 = scmp.ne.s32.totalorder %s337_s24, %s4151_s14  ;;  %p4160_p12 = scmp.lt.s32.totalorder %s4151_s14, %s4151_s14 }
  0x8c   : > { %p4154_p4 = pnand %p4152_p9, %p4565_p8  ;;  %p4161_p2 = por %p4160_p12, %p4159_p11 }
  0x8e   : > { %p4155_p10 = pneg %p4154_p4 }
  0x90   : > { %p4162_p1 = pnand %p4161_p2, %p4155_p10 }
  0x92   : > { %4165 = shalt.err (!%p4162_p1)
}
  0x93   : > { %s5251_s8 = smov 8   ;;  %s5252_s9 = smov 128  }
  0x94   : > { %3887 = dma.hbm_to_vmem [thread:$0]  (!%p4549_p6), %s5250_s2, 2048, %s337_s24, [#allocation8], %s5252_s9, %s5252_s9, %s5251_s8  }
  0x95   : > { %s5253_s4 = sld [smem:[#allocation31_spill]] }
  0x9b   : > { %s4166_s16 = scalar_lea.hbm %s5253_s4, 2048 }
  0x9c   : > { %p4167_p13 = scmp.ne.s32.totalorder %s5253_s4, %s4166_s16  ;;  %p4173_p0 = scmp.lt.u32.totalorder %s4166_s16, %s5253_s4 }
  0x9e   : > { %p4169_p1 = pnand %p4167_p13, %p4565_p8 }
  0xa0   : > { %p4170_p2 = pneg %p4169_p1 }
  0xa2   : > { %p4175_p3 = pnand %p4173_p0, %p4170_p2 }
  0xa4   : > { %4178 = shalt.err (!%p4175_p3)
}
  0xa5   : > { %s4179_s24 = scalar_lea.vmem %s4638_s11, 2048  ;;  %p4187_p4 = scmp.lt.s32.totalorder %s4638_s11, %s4638_s11 }
  0xa6   : > { %p4180_p5 = scmp.ne.s32.totalorder %s4638_s11, %s4179_s24  ;;  %p4188_p10 = scmp.lt.s32.totalorder %s4179_s24, %s4179_s24 }
  0xa8   : > { %p4182_p7 = pnand %p4180_p5, %p4565_p8  ;;  %p4189_p11 = por %p4188_p10, %p4187_p4 }
  0xaa   : > { %p4183_p9 = pneg %p4182_p7 }
  0xac   : > { %p4190_p12 = pnand %p4189_p11, %p4183_p9 }
  0xae   : > { %4193 = shalt.err (!%p4190_p12)
}
  0xaf   : > { %3893 = dma.hbm_to_vmem [thread:$0]  (!%p4549_p6), %s5253_s4, 2048, %s4638_s11, [#allocation11], %s5252_s9, %s5252_s9, %s5251_s8  }
  0xb0   : > { %s4397_s30 = smov [#allocation15]   ;;  %s4194_s7 = scalar_lea.hbm %s5205_s6, 4096 }
  0xb1   : > { %s388_s12 = sshll.u32 %s4397_s30, 4  ;;  %p4195_p13 = scmp.ne.s32.totalorder %s5205_s6, %s4194_s7  ;;  %s389_s12 = int_to_ptr.vmem [resolvable:$true] %s388_s12 }
  0xb2   : > { %p4201_p0 = scmp.lt.u32.totalorder %s4194_s7, %s5205_s6 }
  0xb3   : > { %p4197_p1 = pnand %p4195_p13, %p4565_p8 }
  0xb5   : > { %p4198_p2 = pneg %p4197_p1 }
  0xb7   : > { %p4203_p3 = pnand %p4201_p0, %p4198_p2 }
  0xb9   : > { %4206 = shalt.err (!%p4203_p3)
}
  0xba   : > { %s4207_s11 = scalar_lea.vmem %s389_s12, 4096  ;;  %p4215_p4 = scmp.lt.s32.totalorder %s389_s12, %s389_s12 }
  0xbb   : > { %p4208_p5 = scmp.ne.s32.totalorder %s389_s12, %s4207_s11  ;;  %p4216_p10 = scmp.lt.s32.totalorder %s4207_s11, %s4207_s11 }
  0xbd   : > { %p4210_p7 = pnand %p4208_p5, %p4565_p8  ;;  %p4217_p11 = por %p4216_p10, %p4215_p4 }
  0xbf   : > { %p4211_p9 = pneg %p4210_p7 }
  0xc1   : > { %p4218_p12 = pnand %p4217_p11, %p4211_p9 }
  0xc3   : > { %4221 = shalt.err (!%p4218_p12)
}
  0xc4   : > { %3899 = dma.hbm_to_vmem [thread:$0]  (!%p4549_p6), %s5205_s6, 4096, %s389_s12, [#allocation14], %s5252_s9, %s5252_s9, %s5251_s8  }
  0xc5   : > { %s3179_s23 = sadd.s32 4294967294, %s4386_s27   ;;  %s39_s15 = sadd.s32 1, %s4378_s25 }
  0xc6   : > { %s5254_s30 = sld [smem:[#allocation22_spill]]  ;;  %s42_s13 = sadd.s32 1, %s4382_s26 }
  0xc7   : > { %p40_p8 = scmp.ge.s32.totalorder %s39_s15, 2  ;;  %s49_s16 = sadd.s32 1, %s4366_s22 }
  0xc8   : > { %p56_p13 = scmp.ne.s32.totalorder %s4366_s22, %s4362_s21  ;;  %p57_p1 = scmp.eq.s32.totalorder %s4386_s27, 0 }
  0xc9   : > { %s5293_s15 = smov (%p40_p8, %s39_s15), 0  ;;  %s5255_s7 = sld [smem:[#allocation25_spill]] }
  0xca   : > { %s5295_s13 = smov (!%p40_p8, %s42_s13), %s4382_s26  ;;  %p4718_p2 = por %p57_p1, %p56_p13 }
  0xcb   : > { %p62_p6 = scmp.ne.s32.totalorder %s4362_s21, %s4358_s20  ;;  %p44_p0 = scmp.ge.s32.totalorder %s5295_s13, 2 }
  0xcc   : > { %s283_s28 = ssub.s32 %s4378_s25, %s5293_s15  ;;  %p5257_p3 = scmp.ne.s32.totalorder %s5240_s29, 0 }
  0xcd   : > { %s287_s10 = sadd.s32 1, %s4354_s19  ;;  %s5297_s13 = smov (%p44_p0, %s5295_s13), 0 }
  0xce   : > { %p4728_p5 = por %p5257_p3, %p62_p6  ;;  %p297_p7 = scmp.ne.s32.totalorder %s4354_s19, %s4350_s18 }
  0xcf   : > { %p303_p9 = scmp.ne.s32.totalorder %s4350_s18, %s5254_s30  ;;  %s46_s24 = ssub.s32 %s4382_s26, %s5297_s13 }
  0xd0   : > { %p304_p4 = scmp.eq.s32.totalorder %s3179_s23, 3  ;;  %p47_p10 = scmp.eq.s32.totalorder %s46_s24, 0 }
  0xd1   : > { %s284_s20 = sor.u32 %s283_s28, %s46_s24  ;;  %p5259_p12 = scmp.ne.s32.totalorder %s5255_s7, 0 }
  0xd2   : > { %p285_p11 = scmp.eq.s32.totalorder %s284_s20, 0  ;;  %p4753_p13 = por %p304_p4, %p303_p9 }
  0xd3   : > { %p4743_p8 = por %p5259_p12, %p297_p7  ;;  %p3914_p1 = scmp.lt.s32.totalorder %s4386_s27, 4 }
  0xd4   : > { %s4748_s14 = scalar_select %p47_p10, %s4366_s22, %s49_s16  }
  0xd5   : > { %s5260_s11 = scalar_select %p4743_p8, 1, 0 }
  0xd6   : > { %s4751_s0 = scalar_select %p285_p11, %s4354_s19, %s287_s10  }
  0xd7   : > { %s5261_s1 = scalar_select %p4753_p13, 1, 0 }
  0xd8   : > { %s414_s30 = sand.u32 1, %s4366_s22   ;;  %s3247_s2 = sshll.u32 %s4382_s26, 8 }
  0xd9   : > { %s3188_s23 = sshll.u32 %s414_s30, 4  ;;  %s5262_s24 = sld [smem:[#allocation27_spill]] }
  0xda   : > { %s418_s16 = scalar_lea.vmem [#allocation4], %s3188_s23  ;;  %p4767_p6 = pnand %p3914_p1, %p4718_p2 }
  0xdb   : > { %s425_s10 = sshll.u32 %s418_s16, 4  ;;  %s4773_s5 = scalar_lea.sflag [#allocation5], %s414_s30  ;;  %s4771_s10 = int_to_ptr.vmem [resolvable:$true] %s425_s10 }
  0xdc   : > { %p4224_p3 = pneg %p4767_p6 }
  0xdf   : > { %s5263_s4 = smov %s5262_s24  ;;  %s4763_s7 = scalar_lea.hbm %s5262_s24, %s3247_s2 }
  0xe0   : > { %s4222_s3 = scalar_lea.hbm %s4763_s7, 256  ;;  %s4227_s23 = scalar_lea.hbm %s5263_s4, 512 }
  0xe1   : > { %p4223_p0 = scmp.ne.s32.totalorder %s4763_s7, %s4222_s3  ;;  %p4228_p2 = scmp.lt.u32.totalorder %s4763_s7, %s5263_s4 }
  0xe2   : > { %p4229_p4 = scmp.lt.u32.totalorder %s4227_s23, %s4222_s3  ;;  %p4231_p11 = scmp.lt.u32.totalorder %s4222_s3, %s4763_s7 }
  0xe3   : > { %p4225_p7 = pnand %p4224_p3, %p4223_p0 }
  0xe4   : > { %p4230_p10 = por %p4229_p4, %p4228_p2 }
  0xe5   : > { %p4226_p9 = pneg %p4225_p7 }
  0xe6   : > { %p4232_p12 = por %p4231_p11, %p4230_p10 }
  0xe8   : > { %p4233_p1 = pnand %p4232_p12, %p4226_p9 }
  0xea   : > { %4236 = shalt.err (!%p4233_p1)
}
  0xeb   : > { %s4237_s30 = scalar_lea.vmem %s4771_s10, 256  ;;  %s4398_s16 = smov [#allocation4]  }
  0xec   : > { %p4238_p0 = scmp.ne.s32.totalorder %s4771_s10, %s4237_s30  ;;  %s4242_s2 = sshll.u32 %s4398_s16, 4  ;;  %s4243_s2 = int_to_ptr.vmem [resolvable:$false] %s4242_s2 }
  0xed   : > { %s4244_s12 = scalar_lea.vmem %s4243_s2, 512  ;;  %p4245_p8 = scmp.lt.s32.totalorder %s4771_s10, %s4243_s2 }
  0xee   : > { %p4240_p7 = pnand %p4238_p0, %p4224_p3  ;;  %p4246_p2 = scmp.lt.s32.totalorder %s4244_s12, %s4237_s30 }
  0xf0   : > { %p4241_p13 = pneg %p4240_p7  ;;  %p4247_p4 = por %p4246_p2, %p4245_p8 }
  0xf2   : > { %p4248_p10 = pnand %p4247_p4, %p4241_p13 }
  0xf4   : > { %4251 = shalt.err (!%p4248_p10)
}
  0xf5   : > { %3903 = dma.hbm_to_vmem [thread:$0]  (!%p4767_p6), %s4763_s7, 256, %s4771_s10, %s4773_s5, %s5252_s9, %s5252_s9, %s5251_s8  }
  0xf6   : > { %s5265_s3 = sld [smem:[#allocation26_spill]] }
  0xfc   : > { %p5266_p3 = scmp.ne.s32.totalorder %s5265_s3, 0 }
  0xfd   : > { %s439_s23 = sand.u32 (!%p5266_p3), 1, %s4362_s21  }
  0xfe   : > { %437 = sbr.rel (%p5266_p3) target bundleno = 3146 (0xc4a), region = 64  ;;  %s3192_s28 = sshll.u32 (!%p5266_p3), %s439_s23, 4 }
  0xff   : > { %s440_s24 = scalar_lea.sflag (!%p5266_p3), [#allocation5], %s439_s23  ;;  %s4807_s30 = scalar_lea.vmem (!%p5266_p3), [#allocation4], %s3192_s28 }
 0x105   : > { %4325 = dma.done.wait (%p4728_p5), %s440_s24, 256  }
 0x106   : > { %4327 = vsyncadd (%p4728_p5), %s440_s24, 4294967040  ;;  %p5267_p8 = scmp.ne.s32.totalorder %s5240_s29, 0 }
 0x108   : > { %4329 = dma.done.wait (%p5267_p8), [#allocation8], 4096  }
 0x109   : > { %4331 = vsyncadd (%p5267_p8), [#allocation8], 4294963200 }
 0x10a   : > { %4333 = dma.done.wait (%p5267_p8), [#allocation11], 4096  }
 0x10b   : > { %4335 = vsyncadd (%p5267_p8), [#allocation11], 4294963200 }
 0x10c   : > { %4337 = dma.done.wait (%p5267_p8), [#allocation14], 8192  }
 0x10d   : > { %4339 = vsyncadd (%p5267_p8), [#allocation14], 4294959104  ;;  %s5224_s5 = sand.u32 1, %s4350_s18   ;;  %s5268_s17 = sld [smem:[#allocation23_spill]] }
 0x10e   : > { %s4828_s8 = sshll.u32 %s5224_s5, 3 }
 0x10f   : > { %s505_s9 = scalar_lea.vmem [#allocation16], %s4828_s8 }
 0x113   : > { %p3200_p5 = scmp.ne.s32.totalorder %s5268_s17, 0 }
 0x114   : > { %v512_v0 = vld [vmem:[#allocation9] sm:$0xff] (!%p3200_p5)  ;;  %v513_v1 = vld [vmem:[#allocation9 + $0x8] sm:$0xff] (!%p3200_p5)  ;;  %v514_v2 = vld [vmem:[#allocation9 + $0x10] sm:$0xff] (!%p3200_p5)  ;;  %s4399_s29 = smov (!%p3200_p5), 64   ;;  %s4400_s7 = smov (!%p3200_p5), 96   ;;  %v719_v56 = vlaneseq (!%p3200_p5)  ;;  %vm1406_vm0 = vcmask (!%p3200_p5), 130048  }
 0x115   : > { %509 = sbr.rel (%p3200_p5) target bundleno = 858 (0x35a), region = 96  ;;  %v3621_v3 = vpack.c.bf16 (!%p3200_p5), %v513_v1, %v512_v0  ;;  %v515_v4 = vld [vmem:[#allocation9 + $0x18] sm:$0xff] (!%p3200_p5)  ;;  %v603_v5 = vld [vmem:[#allocation10] sm:$0xff] (!%p3200_p5)  ;;  %v604_v6 = vld [vmem:[#allocation10 + $0x8] sm:$0xff] (!%p3200_p5)  ;;  %s4401_s10 = smov (!%p3200_p5), 32  }
 0x116   : > { %v3625_v7 = vpack.c.bf16 (!%p3200_p5), %v515_v4, %v514_v2  ;;  %v3653_v8 = vpack.c.bf16 (!%p3200_p5), %v604_v6, %v603_v5  ;;  %v516_v9 = vld [vmem:[#allocation9 + $0x20] sm:$0xff] (!%p3200_p5)  ;;  %v517_v10 = vld [vmem:[#allocation9 + $0x28] sm:$0xff] (!%p3200_p5)  ;;  %v605_v11 = vld [vmem:[#allocation10 + $0x10] sm:$0xff] (!%p3200_p5)  ;;  %v4402_v54 = vmov (!%p3200_p5), 1983009808   ;;  %v720_v58 = vshrl.u32 (!%p3200_p5), %v719_v56, 7 }
 0x117   : > { %3622 = vmatprep.subr.bf16.mxu0 (!%p3200_p5), %v3621_v3  ;;  %v606_v12 = vld [vmem:[#allocation10 + $0x18] sm:$0xff] (!%p3200_p5)  ;;  %v607_v14 = vld [vmem:[#allocation10 + $0x20] sm:$0xff] (!%p3200_p5)  ;;  %v608_v15 = vld [vmem:[#allocation10 + $0x28] sm:$0xff] (!%p3200_p5)  ;;  %v3629_v16 = vpack.c.bf16 (!%p3200_p5), %v517_v10, %v516_v9  ;;  %v717_v55 = vunpack.c.l.s4 (!%p3200_p5), %v4402_v54  ;;  %v4403_v61 = vmov (!%p3200_p5), 1934713408  }
 0x118   : > { %3624 = vmatpush3.bf16.msra.mxu0 (!%p3200_p5), %v3621_v3  ;;  %3654 = vmatprep.subr.bf16.mxu1 (!%p3200_p5), %v3653_v8  ;;  %v3657_v13 = vpack.c.bf16 (!%p3200_p5), %v606_v12, %v605_v11  ;;  %v518_v17 = vld [vmem:[#allocation9 + $0x30] sm:$0xff] (!%p3200_p5)  ;;  %v519_v18 = vld [vmem:[#allocation9 + $0x38] sm:$0xff] (!%p3200_p5)  ;;  %v3661_v19 = vpack.c.bf16 (!%p3200_p5), %v608_v15, %v607_v14  ;;  %v520_v23 = vld [vmem:[#allocation9 + $0x40] sm:$0xff] (!%p3200_p5)  ;;  %v749_v62 = vunpack.c.l.s4 (!%p3200_p5), %v4403_v61 }
 0x119   : > { %3626 = vmatprep.subr.bf16.mxu0 (!%p3200_p5), %v3625_v7  ;;  %3656 = vmatpush3.bf16.msra.mxu1 (!%p3200_p5), %v3653_v8  ;;  %v609_v20 = vld [vmem:[#allocation10 + $0x30] sm:$0xff] (!%p3200_p5)  ;;  %v610_v21 = vld [vmem:[#allocation10 + $0x38] sm:$0xff] (!%p3200_p5)  ;;  %v3633_v22 = vpack.c.bf16 (!%p3200_p5), %v519_v18, %v518_v17  ;;  %v521_v24 = vld [vmem:[#allocation9 + $0x48] sm:$0xff] (!%p3200_p5)  ;;  %v718_v57 = vunpack.c.0.s8 (!%p3200_p5), %v717_v55 }
 0x11a   : > { %3658 = vmatprep.subr.bf16.mxu1 (!%p3200_p5), %v3657_v13  ;;  %v3665_v25 = vpack.c.bf16 (!%p3200_p5), %v610_v21, %v609_v20  ;;  %v510_v26 = vld [vmem:[%s4807_s30] sm:$0xff] (!%p3200_p5)  ;;  %v612_v28 = vld [vmem:[#allocation10 + $0x48] sm:$0xff] (!%p3200_p5)  ;;  %v3637_v29 = vpack.c.bf16 (!%p3200_p5), %v521_v24, %v520_v23  ;;  %v523_v31 = vld [vmem:[#allocation9 + $0x58] sm:$0xff] (!%p3200_p5)  ;;  %v750_v6 = vunpack.c.0.s8 (!%p3200_p5), %v749_v62 }
 0x11b   : > { %v611_v27 = vld [vmem:[#allocation10 + $0x40] sm:$0xff] (!%p3200_p5)  ;;  %3425 = vmatprep.mubr.f32.mxu0 (!%p3200_p5), %v510_v26  ;;  %3460 = vmatprep.mubr.f32.mxu1 (!%p3200_p5), %v510_v26  ;;  %v522_v30 = vld [vmem:[#allocation9 + $0x50] sm:$0xff] (!%p3200_p5)  ;;  %v614_v34 = vld [vmem:[#allocation10 + $0x58] sm:$0xff] (!%p3200_p5)  ;;  %v4844_v63 = vsub.s32 (!%p3200_p5), %v718_v57, %v720_v58 }
 0x11c   : > { %3628 = vmatpush3.bf16.msra.mxu0 %v3625_v7  ;;  %v3669_v32 = vpack.c.bf16 %v612_v28, %v611_v27  ;;  %v613_v33 = vld [vmem:[#allocation10 + $0x50] sm:$0xff]  ;;  %v3641_v35 = vpack.c.bf16 %v523_v31, %v522_v30  ;;  %v524_v36 = vld [vmem:[#allocation9 + $0x60] sm:$0xff]  ;;  %v525_v37 = vld [vmem:[#allocation9 + $0x68] sm:$0xff] }
 0x11d   : > { %3630 = vmatprep.subr.bf16.mxu0 %v3629_v16  ;;  %3660 = vmatpush3.bf16.msra.mxu1 %v3657_v13  ;;  %v3673_v38 = vpack.c.bf16 %v614_v34, %v613_v33  ;;  %v615_v39 = vld [vmem:[#allocation10 + $0x60] sm:$0xff]  ;;  %v616_v40 = vld [vmem:[#allocation10 + $0x68] sm:$0xff]  ;;  %v3645_v41 = vpack.c.bf16 %v525_v37, %v524_v36  ;;  %v526_v42 = vld [vmem:[#allocation9 + $0x70] sm:$0xff]  ;;  %v4852_v13 = vsub.s32 %v750_v6, %v720_v58 }
 0x11e   : > { %3662 = vmatprep.subr.bf16.mxu1 %v3661_v19  ;;  %v527_v43 = vld [vmem:[#allocation9 + $0x78] sm:$0xff]  ;;  %v3677_v44 = vpack.c.bf16 %v616_v40, %v615_v39  ;;  %v617_v45 = vld [vmem:[#allocation10 + $0x70] sm:$0xff] }
 0x11f   : > { %v618_v46 = vld [vmem:[#allocation10 + $0x78] sm:$0xff]  ;;  %v3649_v47 = vpack.c.bf16 %v527_v43, %v526_v42 }
 0x120   : > { %3632 = vmatpush3.bf16.msra.mxu0 %v3629_v16  ;;  %v3681_v48 = vpack.c.bf16 %v618_v46, %v617_v45  ;;  %v511_v49 = vld [vmem:[%s4807_s30 + $0x8] sm:$0xff] }
 0x121   : > { %3634 = vmatprep.subr.bf16.mxu0 %v3633_v22  ;;  %3664 = vmatpush3.bf16.msra.mxu1 %v3661_v19 }
 0x122   : > { %3666 = vmatprep.subr.bf16.mxu1 %v3665_v25 }
 0x124   : > { %3636 = vmatpush3.bf16.msra.mxu0 %v3633_v22 }
 0x125   : > { %3638 = vmatprep.subr.bf16.mxu0 %v3637_v29  ;;  %3668 = vmatpush3.bf16.msra.mxu1 %v3665_v25 }
 0x126   : > { %3670 = vmatprep.subr.bf16.mxu1 %v3669_v32 }
 0x128   : > { %3640 = vmatpush3.bf16.msra.mxu0 %v3637_v29 }
 0x129   : > { %3642 = vmatprep.subr.bf16.mxu0 %v3641_v35  ;;  %3672 = vmatpush3.bf16.msra.mxu1 %v3669_v32 }
 0x12a   : > { %3674 = vmatprep.subr.bf16.mxu1 %v3673_v38 }
 0x12c   : > { %3644 = vmatpush3.bf16.msra.mxu0 %v3641_v35 }
 0x12d   : > { %3646 = vmatprep.subr.bf16.mxu0 %v3645_v41  ;;  %3676 = vmatpush3.bf16.msra.mxu1 %v3673_v38 }
 0x12e   : > { %3678 = vmatprep.subr.bf16.mxu1 %v3677_v44 }
 0x130   : > { %3648 = vmatpush3.bf16.msra.mxu0 %v3645_v41 }
 0x131   : > { %3650 = vmatprep.subr.bf16.mxu0 %v3649_v47  ;;  %3680 = vmatpush3.bf16.msra.mxu1 %v3677_v44 }
 0x132   : > { %3682 = vmatprep.subr.bf16.mxu1 %v3681_v48 }
 0x134   : > { %3652 = vmatpush3.bf16.msra.mxu0 %v3649_v47 }
 0x135   : > { %3684 = vmatpush3.bf16.msra.mxu1 %v3681_v48 }
 0x137   : > { %3426 = vmatmul.mubr.f32.vlgmr.msra.gmra.mrb[0].mxu0 %v511_v49 }
 0x138   : > { %3461 = vmatmul.mubr.f32.vlgmr.msra.gmra.mrb[0].mxu1 %v511_v49 }
 0x20a   : > { %v3427_v50 = vpop.f32.mrb[0].mxu0 }
 0x20b   : > { %704 = vrot.lane.b32.xlu1 %v3427_v50, %s4399_s29  ;;  %698 = vrot.lane.b32.xlu0 %v3427_v50, %s4400_s7  ;;  %v594_v51 = vpop.f32.mrb[1].mxu0  ;;  %v4834_v52 = vpop.f32.mrb[0].mxu1 }
 0x20c   : > { %v4836_v53 = vpop.f32.mrb[1].mxu1 }
 0x20f   : > { %990 = vrot.lane.b32.xlu1 %v4834_v52, %s4400_s7  ;;  %710 = vrot.lane.b32.xlu0 %v3427_v50, %s4401_s10 }
 0x213   : > { %708 = vrot.lane.b32.xlu1 %v594_v51, %s4401_s10  ;;  %696 = vrot.lane.b32.xlu0 %v594_v51, %s4400_s7 }
 0x217   : > { %988 = vrot.lane.b32.xlu1 %v4836_v53, %s4400_s7  ;;  %702 = vrot.lane.b32.xlu0 %v594_v51, %s4399_s29 }
 0x21b   : > { %1002 = vrot.lane.b32.xlu1 %v4834_v52, %s4401_s10  ;;  %994 = vrot.lane.b32.xlu0 %v4836_v53, %s4399_s29 }
 0x21f   : > { %1000 = vrot.lane.b32.xlu1 %v4836_v53, %s4401_s10  ;;  %996 = vrot.lane.b32.xlu0 %v4834_v52, %s4399_s29 }
 0x27d   : > { %v705_v59 = vpop.permute.xlu1 %704  ;;  %v699_v60 = vpop.permute.xlu0 %698 }
 0x27e   : > { %v782_v2 = vcombine.low %v3427_v50, %v705_v59  ;;  %v783_v3 = vcombine.high %v3427_v50, %v705_v59 }
 0x280   : > { %v790_v11 = vrot.slane %v782_v2, %v4844_v63  ;;  %v797_v12 = vrot.slane %v783_v3, %v4844_v63 }
 0x281   : > { %v4846_v0 = vpop.permute.xlu1 %990  ;;  %v711_v1 = vpop.permute.xlu0 %710 }
 0x282   : > { %v798_v4 = vcombine.low %v699_v60, %v711_v1  ;;  %v799_v5 = vcombine.high %v699_v60, %v711_v1 }
 0x284   : > { %v806_v7 = vrot.slane %v798_v4, %v4844_v63  ;;  %v813_v8 = vrot.slane %v799_v5, %v4844_v63 }
 0x285   : > { %v709_v9 = vpop.permute.xlu1 %708  ;;  %v697_v10 = vpop.permute.xlu0 %696 }
 0x286   : > { %v814_v14 = vcombine.low %v790_v11, %v806_v7  ;;  %v815_v15 = vcombine.high %v790_v11, %v806_v7  ;;  %v830_v16 = vcombine.low %v797_v12, %v813_v8  ;;  %v831_v17 = vcombine.high %v797_v12, %v813_v8 }
 0x287   : > { %v730_v18 = vcombine.low %v697_v10, %v709_v9  ;;  %v731_v19 = vcombine.high %v697_v10, %v709_v9 }
 0x288   : > { %v822_v24 = vrot.slane %v814_v14, %v4852_v13  ;;  %v829_v25 = vrot.slane %v815_v15, %v4852_v13  ;;  %v838_v26 = vrot.slane %v830_v16, %v4852_v13  ;;  %v845_v27 = vrot.slane %v831_v17, %v4852_v13 }
 0x289   : > { %v989_v20 = vpop.permute.xlu1 %988  ;;  %v703_v21 = vpop.permute.xlu0 %702  ;;  %v738_v28 = vrot.slane %v730_v18, %v4844_v63  ;;  %v745_v29 = vrot.slane %v731_v19, %v4844_v63 }
 0x28a   : > { %v714_v22 = vcombine.low %v594_v51, %v703_v21  ;;  %v715_v23 = vcombine.high %v594_v51, %v703_v21  ;;  %v918_v37 = vcombine.low %v822_v24, %v829_v25  ;;  %v3203_v38 = vcombine.high %v822_v24, %v829_v25 }
 0x28b   : > { %v934_v39 = vcombine.low %v838_v26, %v845_v27  ;;  %v3204_v40 = vcombine.high %v838_v26, %v845_v27 }
 0x28c   : > { %v722_v30 = vrot.slane %v714_v22, %v4844_v63  ;;  %v729_v31 = vrot.slane %v715_v23, %v4844_v63  ;;  %v4867_v51 = vrot.slane %v918_v37, %v4844_v63  ;;  %v4870_v54 = vrot.slane %v3203_v38, %v4844_v63 }
 0x28d   : > { %v1003_v32 = vpop.permute.xlu1 %1002  ;;  %v995_v41 = vpop.permute.xlu0 %994  ;;  %v4873_v55 = vrot.slane %v934_v39, %v4844_v63  ;;  %v4876_v56 = vrot.slane %v3204_v40, %v4844_v63 }
 0x28e   : > { %v746_v33 = vcombine.low %v722_v30, %v738_v28  ;;  %v747_v34 = vcombine.high %v722_v30, %v738_v28  ;;  %v762_v35 = vcombine.low %v729_v31, %v745_v29  ;;  %v763_v36 = vcombine.high %v729_v31, %v745_v29 }
 0x28f   : > { %v1006_v2 = vcombine.low %v4836_v53, %v995_v41  ;;  %v1007_v3 = vcombine.high %v4836_v53, %v995_v41  ;;  %v950_v8 = vcombine.low %v4867_v51, %v4870_v54  ;;  %v966_v9 = vcombine.low %v4873_v55, %v4876_v56 }
 0x290   : > { %v754_v42 = vrot.slane %v746_v33, %v4852_v13  ;;  %v761_v43 = vrot.slane %v747_v34, %v4852_v13  ;;  %v770_v44 = vrot.slane %v762_v35, %v4852_v13  ;;  %v777_v45 = vrot.slane %v763_v36, %v4852_v13 }
 0x291   : > { %v1001_v50 = vpop.permute.xlu1 %1000  ;;  %v997_v57 = vpop.permute.xlu0 %996  ;;  %v1090_v10 = vcombine.low %v4846_v0, %v1003_v32  ;;  %v1091_v11 = vcombine.high %v4846_v0, %v1003_v32  ;;  %v1014_v15 = vrot.slane %v1006_v2, %v4844_v63  ;;  %v1021_v16 = vrot.slane %v1007_v3, %v4844_v63 }
 0x292   : > { %v850_v46 = vcombine.low %v754_v42, %v761_v43  ;;  %v3201_v47 = vcombine.high %v754_v42, %v761_v43  ;;  %v866_v48 = vcombine.low %v770_v44, %v777_v45  ;;  %v3202_v49 = vcombine.high %v770_v44, %v777_v45 }
 0x293   : > { %v1022_v62 = vcombine.low %v989_v20, %v1001_v50  ;;  %v1023_v1 = vcombine.high %v989_v20, %v1001_v50  ;;  %v1074_v4 = vcombine.low %v4834_v52, %v997_v57  ;;  %v1075_v5 = vcombine.high %v4834_v52, %v997_v57 }
 0x294   : > { %v857_v58 = vrot.slane %v850_v46, %v4844_v63  ;;  %v865_v59 = vrot.slane %v3201_v47, %v4844_v63  ;;  %v873_v60 = vrot.slane %v866_v48, %v4844_v63  ;;  %v881_v61 = vrot.slane %v3202_v49, %v4844_v63 }
 0x295   : > { %v1030_v12 = vrot.slane %v1022_v62, %v4844_v63  ;;  %v1037_v53 = vrot.slane %v1023_v1, %v4844_v63  ;;  %v1082_v17 = vrot.slane %v1074_v4, %v4844_v63  ;;  %v1089_v18 = vrot.slane %v1075_v5, %v4844_v63 }
 0x296   : > { %v882_v6 = vcombine.low %v857_v58, %v865_v59  ;;  %v898_v7 = vcombine.low %v873_v60, %v881_v61  ;;  %v958_v0 = vrot.slane %v950_v8, %v4852_v13  ;;  %v974_v21 = vrot.slane %v966_v9, %v4852_v13 }
 0x297   : > { %v1098_v22 = vrot.slane %v1090_v10, %v4844_v63  ;;  %v1105_v23 = vrot.slane %v1091_v11, %v4844_v63  ;;  %v1038_v24 = vcombine.low %v1014_v15, %v1030_v12  ;;  %v1039_v25 = vcombine.high %v1014_v15, %v1030_v12 }
 0x298   : > { %v890_v14 = vrot.slane %v882_v6, %v4852_v13  ;;  %v906_v52 = vrot.slane %v898_v7, %v4852_v13  ;;  %v1054_v26 = vcombine.low %v1021_v16, %v1037_v53  ;;  %v1055_v27 = vcombine.high %v1021_v16, %v1037_v53 }
 0x299   : > { %v1106_v28 = vcombine.low %v1082_v17, %v1098_v22  ;;  %v1107_v29 = vcombine.high %v1082_v17, %v1098_v22  ;;  %v1122_v30 = vcombine.low %v1089_v18, %v1105_v23  ;;  %v1123_v31 = vcombine.high %v1089_v18, %v1105_v23 }
 0x29a   : > { %v915_v19 = vcombine.high %v890_v14, %v906_v52  ;;  %v914_v20 = vcombine.low %v890_v14, %v906_v52  ;;  %v983_v32 = vcombine.high %v958_v0, %v974_v21  ;;  %v982_v33 = vcombine.low %v958_v0, %v974_v21 }
 0x29b   : > { %v1046_v34 = vrot.slane %v1038_v24, %v4852_v13  ;;  %v883_v35 = vcombine.high %v857_v58, %v865_v59  ;;  %v899_v36 = vcombine.high %v873_v60, %v881_v61  ;;  %v1053_v37 = vrot.slane %v1039_v25, %v4852_v13 }
 0x29c   : > { %1310 = vxpose.xlu1.b32.start [1/2] (short) (narrow) %v915_v19, 32  ;;  %1278 = vxpose.xlu0.b32.start [1/2] (short) (narrow) %v914_v20, 32  ;;  %v1062_v38 = vrot.slane %v1054_v26, %v4852_v13  ;;  %v1069_v39 = vrot.slane %v1055_v27, %v4852_v13  ;;  %v1114_v40 = vrot.slane %v1106_v28, %v4852_v13 }
 0x29d   : > { %v1121_v41 = vrot.slane %v1107_v29, %v4852_v13  ;;  %v1130_v42 = vrot.slane %v1122_v30, %v4852_v13  ;;  %v1137_v43 = vrot.slane %v1123_v31, %v4852_v13  ;;  %v897_v44 = vrot.slane %v883_v35, %v4852_v13 }
 0x29e   : > { %v913_v45 = vrot.slane %v899_v36, %v4852_v13  ;;  %v951_v46 = vcombine.high %v4867_v51, %v4870_v54  ;;  %v967_v47 = vcombine.high %v4873_v55, %v4876_v56  ;;  %v1142_v48 = vcombine.low %v1046_v34, %v1053_v37 }
 0x29f   : > { %v3205_v49 = vcombine.high %v1046_v34, %v1053_v37  ;;  %v1158_v50 = vcombine.low %v1062_v38, %v1069_v39  ;;  %v3206_v57 = vcombine.high %v1062_v38, %v1069_v39  ;;  %v1210_v58 = vcombine.low %v1114_v40, %v1121_v41 }
 0x2a0   : > { %1311 = vxpose.xlu1.b32.end [2/2] (short) (narrow) %v983_v32, 32  ;;  %1279 = vxpose.xlu0.b32.end [2/2] (short) (narrow) %v982_v33, 32  ;;  %v3207_v59 = vcombine.high %v1114_v40, %v1121_v41  ;;  %v1226_v60 = vcombine.low %v1130_v42, %v1137_v43  ;;  %v3208_v61 = vcombine.high %v1130_v42, %v1137_v43 }
 0x2a1   : > { %v917_v62 = vcombine.high %v897_v44, %v913_v45  ;;  %v916_v1 = vcombine.low %v897_v44, %v913_v45  ;;  %v965_v2 = vrot.slane %v951_v46, %v4852_v13  ;;  %v981_v3 = vrot.slane %v967_v47, %v4852_v13 }
 0x2a2   : > { %v1149_v4 = vrot.slane %v1142_v48, %v4844_v63  ;;  %v1157_v51 = vrot.slane %v3205_v49, %v4844_v63  ;;  %v1165_v54 = vrot.slane %v1158_v50, %v4844_v63  ;;  %v1173_v55 = vrot.slane %v3206_v57, %v4844_v63 }
 0x2a3   : > { %v985_v56 = vcombine.high %v965_v2, %v981_v3  ;;  %v984_v5 = vcombine.low %v965_v2, %v981_v3  ;;  %v1217_v6 = vrot.slane %v1210_v58, %v4844_v63  ;;  %v1225_v7 = vrot.slane %v3207_v59, %v4844_v63 }
 0x2a4   : > { %v1174_v8 = vcombine.low %v1149_v4, %v1157_v51  ;;  %v1190_v9 = vcombine.low %v1165_v54, %v1173_v55  ;;  %v1233_v10 = vrot.slane %v1226_v60, %v4844_v63  ;;  %v1241_v11 = vrot.slane %v3208_v61, %v4844_v63 }
 0x2a5   : > { %v1242_v14 = vcombine.low %v1217_v6, %v1225_v7  ;;  %v1175_v0 = vcombine.high %v1149_v4, %v1157_v51  ;;  %v1191_v63 = vcombine.high %v1165_v54, %v1173_v55  ;;  %v1243_v23 = vcombine.high %v1217_v6, %v1225_v7 }
 0x2a6   : > { %v1182_v12 = vrot.slane %v1174_v8, %v4852_v13  ;;  %v1198_v53 = vrot.slane %v1190_v9, %v4852_v13  ;;  %v1258_v52 = vcombine.low %v1233_v10, %v1241_v11  ;;  %v1259_v24 = vcombine.high %v1233_v10, %v1241_v11 }
 0x2a7   : > { %v1250_v17 = vrot.slane %v1242_v14, %v4852_v13  ;;  %v1189_v21 = vrot.slane %v1175_v0, %v4852_v13  ;;  %v1205_v22 = vrot.slane %v1191_v63, %v4852_v13  ;;  %v1257_v27 = vrot.slane %v1243_v23, %v4852_v13 }
 0x2a8   : > { %v1207_v15 = vcombine.high %v1182_v12, %v1198_v53  ;;  %v1206_v16 = vcombine.low %v1182_v12, %v1198_v53  ;;  %v1266_v18 = vrot.slane %v1258_v52, %v4852_v13  ;;  %v1273_v28 = vrot.slane %v1259_v24, %v4852_v13 }
 0x2a9   : > { %1374 = vxpose.xlu1.b32.start [1/2] (short) (narrow) %v917_v62, 32  ;;  %1342 = vxpose.xlu0.b32.start [1/2] (short) (narrow) %v916_v1, 32  ;;  %v1209_v25 = vcombine.high %v1189_v21, %v1205_v22  ;;  %v1208_v26 = vcombine.low %v1189_v21, %v1205_v22 }
 0x2aa   : > { %v1275_v19 = vcombine.high %v1250_v17, %v1266_v18  ;;  %v1274_v20 = vcombine.low %v1250_v17, %v1266_v18  ;;  %v1277_v29 = vcombine.high %v1257_v27, %v1273_v28  ;;  %v1276_v30 = vcombine.low %v1257_v27, %v1273_v28 }
 0x2ad   : > { %1375 = vxpose.xlu1.b32.end [2/2] (short) (narrow) %v985_v56, 32  ;;  %1343 = vxpose.xlu0.b32.end [2/2] (short) (narrow) %v984_v5, 32 }
 0x2b6   : > { %1455 = vxpose.xlu1.b32.start [1/2] (short) (narrow) %v1207_v15, 32  ;;  %1423 = vxpose.xlu0.b32.start [1/2] (short) (narrow) %v1206_v16, 32 }
 0x2ba   : > { %1456 = vxpose.xlu1.b32.end [2/2] (short) (narrow) %v1275_v19, 32  ;;  %1424 = vxpose.xlu0.b32.end [2/2] (short) (narrow) %v1274_v20, 32 }
 0x2c3   : > { %1519 = vxpose.xlu1.b32.start [1/2] (short) (narrow) %v1209_v25, 32  ;;  %1487 = vxpose.xlu0.b32.start [1/2] (short) (narrow) %v1208_v26, 32 }
 0x2c7   : > { %1520 = vxpose.xlu1.b32.end [2/2] (short) (narrow) %v1277_v29, 32  ;;  %1488 = vxpose.xlu0.b32.end [2/2] (short) (narrow) %v1276_v30, 32 }
 0x31c   : > { %v1326_v31 = vpop.trf.xlu1  ;;  %v1294_v32 = vpop.trf.xlu0 }
 0x31d   : > { %1411 = vst.msk [vmem:[#allocation2 + $0x20] sm:$0xff] %vm1406_vm0, %v1326_v31  ;;  %1407 = vst.msk [vmem:[#allocation2] sm:$0xff] %vm1406_vm0, %v1294_v32 }
 0x320   : > { %v1327_v33 = vpop.trf.xlu1  ;;  %v1295_v34 = vpop.trf.xlu0 }
 0x321   : > { %1412 = vst.msk [vmem:[#allocation2 + $0x28] sm:$0xff] %vm1406_vm0, %v1327_v33  ;;  %1408 = vst.msk [vmem:[#allocation2 + $0x8] sm:$0xff] %vm1406_vm0, %v1295_v34 }
 0x324   : > { %v1328_v13 = vpop.trf.xlu1  ;;  %v1296_v35 = vpop.trf.xlu0 }
 0x325   : > { %1413 = vst.msk [vmem:[#allocation2 + $0x30] sm:$0xff] %vm1406_vm0, %v1328_v13  ;;  %1409 = vst.msk [vmem:[#allocation2 + $0x10] sm:$0xff] %vm1406_vm0, %v1296_v35 }
 0x328   : > { %v1329_v36 = vpop.trf.xlu1  ;;  %v1297_v37 = vpop.trf.xlu0 }
 0x329   : > { %1414 = vst.msk [vmem:[#allocation2 + $0x38] sm:$0xff] %vm1406_vm0, %v1329_v36  ;;  %1410 = vst.msk [vmem:[#allocation2 + $0x18] sm:$0xff] %vm1406_vm0, %v1297_v37 }
 0x32c   : > { %v1390_v38 = vpop.trf.xlu1  ;;  %v1358_v39 = vpop.trf.xlu0 }
 0x32d   : > { %1419 = vst.msk [vmem:[#allocation2 + $0x60] sm:$0xff] %vm1406_vm0, %v1390_v38  ;;  %1415 = vst.msk [vmem:[#allocation2 + $0x40] sm:$0xff] %vm1406_vm0, %v1358_v39 }
 0x330   : > { %v1391_v40 = vpop.trf.xlu1  ;;  %v1359_v41 = vpop.trf.xlu0 }
 0x331   : > { %1420 = vst.msk [vmem:[#allocation2 + $0x68] sm:$0xff] %vm1406_vm0, %v1391_v40  ;;  %1416 = vst.msk [vmem:[#allocation2 + $0x48] sm:$0xff] %vm1406_vm0, %v1359_v41 }
 0x334   : > { %v1392_v42 = vpop.trf.xlu1  ;;  %v1360_v43 = vpop.trf.xlu0 }
 0x335   : > { %1421 = vst.msk [vmem:[#allocation2 + $0x70] sm:$0xff] %vm1406_vm0, %v1392_v42  ;;  %1417 = vst.msk [vmem:[#allocation2 + $0x50] sm:$0xff] %vm1406_vm0, %v1360_v43 }
 0x338   : > { %v1393_v44 = vpop.trf.xlu1  ;;  %v1361_v45 = vpop.trf.xlu0 }
 0x339   : > { %1422 = vst.msk [vmem:[#allocation2 + $0x78] sm:$0xff] %vm1406_vm0, %v1393_v44  ;;  %1418 = vst.msk [vmem:[#allocation2 + $0x58] sm:$0xff] %vm1406_vm0, %v1361_v45 }
 0x33c   : > { %v1471_v46 = vpop.trf.xlu1  ;;  %v1439_v47 = vpop.trf.xlu0 }
 0x33d   : > { %1555 = vst.msk [vmem:[#allocation3 + $0x20] sm:$0xff] %vm1406_vm0, %v1471_v46  ;;  %1551 = vst.msk [vmem:[#allocation3] sm:$0xff] %vm1406_vm0, %v1439_v47 }
 0x340   : > { %v1472_v48 = vpop.trf.xlu1  ;;  %v1440_v49 = vpop.trf.xlu0 }
 0x341   : > { %1556 = vst.msk [vmem:[#allocation3 + $0x28] sm:$0xff] %vm1406_vm0, %v1472_v48  ;;  %1552 = vst.msk [vmem:[#allocation3 + $0x8] sm:$0xff] %vm1406_vm0, %v1440_v49 }
 0x344   : > { %v1473_v50 = vpop.trf.xlu1  ;;  %v1441_v57 = vpop.trf.xlu0 }
 0x345   : > { %1557 = vst.msk [vmem:[#allocation3 + $0x30] sm:$0xff] %vm1406_vm0, %v1473_v50  ;;  %1553 = vst.msk [vmem:[#allocation3 + $0x10] sm:$0xff] %vm1406_vm0, %v1441_v57 }
 0x348   : > { %v1474_v58 = vpop.trf.xlu1  ;;  %v1442_v59 = vpop.trf.xlu0 }
 0x349   : > { %1558 = vst.msk [vmem:[#allocation3 + $0x38] sm:$0xff] %vm1406_vm0, %v1474_v58  ;;  %1554 = vst.msk [vmem:[#allocation3 + $0x18] sm:$0xff] %vm1406_vm0, %v1442_v59 }
 0x34c   : > { %v1535_v60 = vpop.trf.xlu1  ;;  %v1503_v61 = vpop.trf.xlu0 }
 0x34d   : > { %1563 = vst.msk [vmem:[#allocation3 + $0x60] sm:$0xff] %vm1406_vm0, %v1535_v60  ;;  %1559 = vst.msk [vmem:[#allocation3 + $0x40] sm:$0xff] %vm1406_vm0, %v1503_v61 }
 0x350   : > { %v1536_v62 = vpop.trf.xlu1  ;;  %v1504_v1 = vpop.trf.xlu0 }
 0x351   : > { %1564 = vst.msk [vmem:[#allocation3 + $0x68] sm:$0xff] %vm1406_vm0, %v1536_v62  ;;  %1560 = vst.msk [vmem:[#allocation3 + $0x48] sm:$0xff] %vm1406_vm0, %v1504_v1 }
 0x354   : > { %v1537_v2 = vpop.trf.xlu1  ;;  %v1505_v3 = vpop.trf.xlu0 }
 0x355   : > { %1565 = vst.msk [vmem:[#allocation3 + $0x70] sm:$0xff] %vm1406_vm0, %v1537_v2  ;;  %1561 = vst.msk [vmem:[#allocation3 + $0x50] sm:$0xff] %vm1406_vm0, %v1505_v3 }
 0x358   : > { %v1538_v4 = vpop.trf.xlu1  ;;  %v1506_v51 = vpop.trf.xlu0 }
 0x359   : > { %1566 = vst.msk [vmem:[#allocation3 + $0x78] sm:$0xff] %vm1406_vm0, %v1538_v4  ;;  %1562 = vst.msk [vmem:[#allocation3 + $0x58] sm:$0xff] %vm1406_vm0, %v1506_v51 }
 0x35a PF: > { %v1570_v54 = vld [vmem:[#allocation7] sm:$0xff]  ;;  %v1571_v55 = vld [vmem:[#allocation7 + $0x8] sm:$0xff]  ;;  %v1572_v56 = vld [vmem:[#allocation7 + $0x10] sm:$0xff]  ;;  %v4404_v5 = vmov 0.0|0.0   ;;  %vm4405_vm1 = vmmov 0   ;;  %v4406_v8 = vmov 0.0   ;;  %v1671_v35 = vlaneseq }
 0x35b   : > { %3685 = vmatprep.subr.bf16.mxu0 %v4404_v5  ;;  %v3686_v6 = vpack.c.bf16 %v1571_v55, %v1570_v54  ;;  %v1573_v7 = vld [vmem:[#allocation7 + $0x18] sm:$0xff]  ;;  %3495 = vmatprep.mubr.msk.f32.mxu0 %vm4405_vm1, %v4406_v8  ;;  %v1574_v10 = vld [vmem:[#allocation7 + $0x20] sm:$0xff]  ;;  %v1575_v11 = vld [vmem:[#allocation7 + $0x28] sm:$0xff]  ;;  %s5269_s20 = sld [smem:[#allocation23_spill]]  ;;  %s4407_s12 = smov 32   ;;  %vm1818_vm2 = vcmask 261120  }
 0x35c   : > { %3709 = vmatprep.subr.bf16.mxu1 %v4404_v5  ;;  %3506 = vmatprep.mubr.msk.f32.mxu1 %vm4405_vm1, %v4406_v8  ;;  %v3689_v9 = vpack.c.bf16 %v1573_v7, %v1572_v56  ;;  %v3692_v12 = vpack.c.bf16 %v1575_v11, %v1574_v10  ;;  %v1576_v53 = vld [vmem:[#allocation7 + $0x30] sm:$0xff]  ;;  %v1577_v14 = vld [vmem:[#allocation7 + $0x38] sm:$0xff]  ;;  %v1578_v15 = vld [vmem:[#allocation7 + $0x40] sm:$0xff]  ;;  %s4408_s3 = smov 96   ;;  %s4409_s23 = smov 64   ;;  %v1672_v39 = vshrl.u32 %v1671_v35, 7 }
 0x35d   : > { %3687 = vmatpush3.bf16.msra.mxu0 %v3686_v6  ;;  %v3695_v52 = vpack.c.bf16 %v1577_v14, %v1576_v53  ;;  %v1579_v16 = vld [vmem:[#allocation7 + $0x48] sm:$0xff]  ;;  %v1580_v18 = vld [vmem:[#allocation7 + $0x50] sm:$0xff]  ;;  %v1581_v19 = vld [vmem:[#allocation7 + $0x58] sm:$0xff]  ;;  %v4410_v34 = vmov 1983009808   ;;  %vm2111_vm3 = vcmask 130048  }
 0x35e   : > { %3688 = vmatprep.subr.bf16.mxu0 %v4404_v5  ;;  %v3698_v17 = vpack.c.bf16 %v1579_v16, %v1578_v15  ;;  %v3701_v20 = vpack.c.bf16 %v1581_v19, %v1580_v18  ;;  %v1582_v0 = vld [vmem:[#allocation7 + $0x60] sm:$0xff]  ;;  %v1583_v63 = vld [vmem:[#allocation7 + $0x68] sm:$0xff]  ;;  %v1584_v22 = vld [vmem:[#allocation7 + $0x70] sm:$0xff]  ;;  %v1669_v13 = vunpack.c.l.s4 %v4410_v34  ;;  %v4411_v36 = vmov 1934713408   ;;  %s5273_s7 = sld [smem:[#allocation34_spill]] }
 0x35f   : > { %v3704_v21 = vpack.c.bf16 %v1583_v63, %v1582_v0  ;;  %v1585_v23 = vld [vmem:[#allocation7 + $0x78] sm:$0xff]  ;;  %v1802_v26 = vld [vmem:[#allocation2] sm:$0xff]  ;;  %v1803_v27 = vld [vmem:[#allocation2 + $0x8] sm:$0xff]  ;;  %v1701_v37 = vunpack.c.l.s4 %v4411_v36  ;;  %vm2661_vm5 = vcmask 523264   ;;  %vm2663_vm6 = vcmask 785408   ;;  %s5274_s10 = sld [smem:[#allocation24_spill]] }
 0x360   : > { %v3707_v24 = vpack.c.bf16 %v1585_v23, %v1584_v22  ;;  %v3710_v29 = vpack.c.bf16 %v1803_v27, %v1802_v26  ;;  %v1804_v31 = vld [vmem:[#allocation2 + $0x10] sm:$0xff]  ;;  %v1805_v32 = vld [vmem:[#allocation2 + $0x18] sm:$0xff]  ;;  %v1670_v38 = vunpack.c.0.s8 %v1669_v13  ;;  %v1806_v14 = vld [vmem:[#allocation2 + $0x20] sm:$0xff]  ;;  %s3036_s29 = sshll.u32 %s505_s9, 4  ;;  %s5277_s5 = sld [smem:[#allocation37_spill]]  ;;  %s5135_s29 = int_to_ptr.vmem [resolvable:$true] %s3036_s29 }
 0x361   : > { %3690 = vmatpush3.bf16.msra.mxu0 %v3689_v9  ;;  %s3209_s16 = sshll.u32 %s5269_s20, 3  ;;  %v3713_v33 = vpack.c.bf16 %v1805_v32, %v1804_v31  ;;  %v1702_v42 = vunpack.c.0.s8 %v1701_v37  ;;  %v1808_v19 = vld [vmem:[#allocation2 + $0x30] sm:$0xff]  ;;  %v1810_v63 = vld [vmem:[#allocation2 + $0x40] sm:$0xff]  ;;  %v1817_v36 = vld [vmem:[#allocation2 + $0x78] sm:$0xff]  ;;  %p5279_p6 = scmp.ne.s32.totalorder %s5260_s11, 0 }
 0x362   : > { %3691 = vmatprep.subr.bf16.mxu0 %v4404_v5  ;;  %s1568_s2 = scalar_lea.vmem %s4807_s30, %s3209_s16 [#allocation4]  ;;  %3711 = vmatpush3.bf16.msra.mxu1 %v3710_v29  ;;  %v4994_v43 = vsub.s32 %v1670_v38, %v1672_v39  ;;  %v1812_v27 = vld [vmem:[#allocation2 + $0x50] sm:$0xff]  ;;  %v1814_v32 = vld [vmem:[#allocation2 + $0x60] sm:$0xff]  ;;  %vm5038_vm4 = vmpackc.low %vm2111_vm3, %vm2111_vm3  ;;  %s5272_s30 = sld [smem:[#allocation33_spill]] }
 0x363   : > { %v4983_v25 = vld [vmem:[%s1568_s2] sm:$0xff]  ;;  %3712 = vmatprep.subr.bf16.mxu1 %v4404_v5  ;;  %v4996_v49 = vsub.s32 %v1702_v42, %v1672_v39  ;;  %v1816_v35 = vld [vmem:[#allocation2 + $0x70] sm:$0xff] }
 0x364   : > { %v3731_v37 = vpack.c.bf16 %v1817_v36, %v1816_v35  ;;  %v2168_v36 = vld [vmem:[#allocation3 + $0x60] sm:$0xff] }
 0x365   : > { %3693 = vmatpush3.bf16.msra.mxu0 %v3692_v12  ;;  %s3243_s16 = sshll.u32 %s5274_s10, 1 }
 0x366   : > { %3694 = vmatprep.subr.bf16.mxu0 %v4404_v5  ;;  %3714 = vmatpush3.bf16.msra.mxu1 %v3713_v33  ;;  %v1815_v33 = vld [vmem:[#allocation2 + $0x68] sm:$0xff]  ;;  %s3032_s2 = sadd.s32 %s5269_s20, %s3243_s16  ;;  %s5278_s20 = sand.u32 1, %s4350_s18  }
 0x367   : > { %3715 = vmatprep.subr.bf16.mxu1 %v4404_v5  ;;  %v3728_v34 = vpack.c.bf16 %v1815_v33, %v1814_v32  ;;  %s3244_s17 = sshll.u32 %s3032_s2, 7  ;;  %s3021_s16 = scalar_lea.sflag [#allocation6], %s5278_s20 }
 0x368   : > { %s5133_s4 = scalar_lea.hbm %s5277_s5, %s3244_s17  ;;  %s4412_s2 = smov [#allocation16]  }
 0x369   : > { %3696 = vmatpush3.bf16.msra.mxu0 %v3695_v52  ;;  %v1807_v52 = vld [vmem:[#allocation2 + $0x28] sm:$0xff] }
 0x36a   : > { %3697 = vmatprep.subr.bf16.mxu0 %v4404_v5 }
 0x36d   : > { %3699 = vmatpush3.bf16.msra.mxu0 %v3698_v17  ;;  %v3716_v17 = vpack.c.bf16 %v1807_v52, %v1806_v14 }
 0x36e   : > { %3700 = vmatprep.subr.bf16.mxu0 %v4404_v5 }
 0x371   : > { %3702 = vmatpush3.bf16.msra.mxu0 %v3701_v20  ;;  %v1809_v20 = vld [vmem:[#allocation2 + $0x38] sm:$0xff] }
 0x372   : > { %3703 = vmatprep.subr.bf16.mxu0 %v4404_v5  ;;  %v3719_v0 = vpack.c.bf16 %v1809_v20, %v1808_v19 }
 0x375   : > { %3705 = vmatpush3.bf16.msra.mxu0 %v3704_v21  ;;  %v1811_v21 = vld [vmem:[#allocation2 + $0x48] sm:$0xff] }
 0x376   : > { %3706 = vmatprep.subr.bf16.mxu0 %v4404_v5  ;;  %v3722_v22 = vpack.c.bf16 %v1811_v21, %v1810_v63  ;;  %v2165_v63 = vld [vmem:[#allocation3 + $0x48] sm:$0xff] }
 0x379   : > { %3708 = vmatpush3.bf16.msra.mxu0 %v3707_v24 }
 0x37a   : > { %3749 = vmatprep.subr.bf16.mxu0 %v4404_v5 }
 0x37c   : > { %3496 = vmatmul.mubr.f32.vlgmr.msra.gmra.mrb[0].mxu0 %v4983_v25 }
 0x37d   : > { %3572 = vmatprep.mubr.msk.f32.mxu0 %vm4405_vm1, %v4406_v8 }
 0x44f   : > { %v1652_v28 = vpop.f32.mrb[0].mxu0 }
 0x450   : > { %1663 = vrot.lane.b32.xlu1 %v1652_v28, %s4407_s12  ;;  %1657 = vrot.lane.b32.xlu0 %v1652_v28, %s4408_s3  ;;  %v3497_v30 = vpop.f32.mrb[1].mxu0 }
 0x454   : > { %1660 = vrot.lane.b32.xlu0 %v1652_v28, %s4409_s23 }
 0x4c2   : > { %v1664_v40 = vpop.permute.xlu1 %1663  ;;  %v1658_v41 = vpop.permute.xlu0 %1657 }
 0x4c3   : > { %v1682_v44 = vcombine.low %v1658_v41, %v1664_v40  ;;  %v1683_v45 = vcombine.high %v1658_v41, %v1664_v40 }
 0x4c5   : > { %v1690_v50 = vrot.slane %v1682_v44, %v4994_v43  ;;  %v1697_v57 = vrot.slane %v1683_v45, %v4994_v43 }
 0x4c6   : > { %v1661_v46 = vpop.permute.xlu0 %1660 }
 0x4c7   : > { %v1666_v47 = vcombine.low %v1652_v28, %v1661_v46  ;;  %v1667_v48 = vcombine.high %v1652_v28, %v1661_v46  ;;  %v1813_v28 = vld [vmem:[#allocation2 + $0x58] sm:$0xff] }
 0x4c8   : > { %v3725_v29 = vpack.c.bf16 %v1813_v28, %v1812_v27  ;;  %v2160_v27 = vld [vmem:[#allocation3 + $0x20] sm:$0xff]  ;;  %v2161_v28 = vld [vmem:[#allocation3 + $0x28] sm:$0xff] }
 0x4c9   : > { %v1674_v58 = vrot.slane %v1666_v47, %v4994_v43  ;;  %v1681_v59 = vrot.slane %v1667_v48, %v4994_v43 }
 0x4cb   : > { %v1698_v60 = vcombine.low %v1674_v58, %v1690_v50  ;;  %v1699_v61 = vcombine.high %v1674_v58, %v1690_v50  ;;  %v1714_v62 = vcombine.low %v1681_v59, %v1697_v57  ;;  %v1715_v1 = vcombine.high %v1681_v59, %v1697_v57  ;;  %v2156_v59 = vld [vmem:[#allocation3] sm:$0xff] }
 0x4cd   : > { %v1706_v2 = vrot.slane %v1698_v60, %v4996_v49  ;;  %v1713_v3 = vrot.slane %v1699_v61, %v4996_v49  ;;  %v1722_v4 = vrot.slane %v1714_v62, %v4996_v49  ;;  %v1729_v51 = vrot.slane %v1715_v1, %v4996_v49  ;;  %v2157_v60 = vld [vmem:[#allocation3 + $0x8] sm:$0xff] }
 0x4ce   : > { %v3734_v62 = vpack.c.bf16 %v2157_v60, %v2156_v59  ;;  %v2667_v59 = vld [vmem:[#allocation12 + $0x10] sm:$0xff] }
 0x4cf   : > { %v1734_v54 = vcombine.low %v1706_v2, %v1713_v3  ;;  %v3210_v55 = vcombine.high %v1706_v2, %v1713_v3  ;;  %v1750_v56 = vcombine.low %v1722_v4, %v1729_v51  ;;  %v3211_v6 = vcombine.high %v1722_v4, %v1729_v51 }
 0x4d1   : > { %v1741_v7 = vrot.slane %v1734_v54, %v4994_v43  ;;  %v1749_v9 = vrot.slane %v3210_v55, %v4994_v43  ;;  %v1757_v10 = vrot.slane %v1750_v56, %v4994_v43  ;;  %v1765_v11 = vrot.slane %v3211_v6, %v4994_v43 }
 0x4d3   : > { %v1766_v12 = vcombine.low %v1741_v7, %v1749_v9  ;;  %v1782_v53 = vcombine.low %v1757_v10, %v1765_v11  ;;  %v1767_v23 = vcombine.high %v1741_v7, %v1749_v9  ;;  %v1783_v24 = vcombine.high %v1757_v10, %v1765_v11 }
 0x4d5   : > { %v1774_v15 = vrot.slane %v1766_v12, %v4996_v49  ;;  %v1790_v16 = vrot.slane %v1782_v53, %v4996_v49  ;;  %v1781_v30 = vrot.slane %v1767_v23, %v4996_v49  ;;  %v1797_v31 = vrot.slane %v1783_v24, %v4996_v49  ;;  %v2167_v23 = vld [vmem:[#allocation3 + $0x58] sm:$0xff] }
 0x4d7   : > { %v1798_v18 = vcombine.low %v1774_v15, %v1790_v16  ;;  %v1799_v26 = vcombine.high %v1774_v15, %v1790_v16  ;;  %v1800_v13 = vcombine.low %v1781_v30, %v1797_v31  ;;  %v1801_v38 = vcombine.high %v1781_v30, %v1797_v31  ;;  %v2158_v16 = vld [vmem:[#allocation3 + $0x10] sm:$0xff] }
 0x4d8   : > { %v3742_v30 = vpack.c.bf16 %v2161_v28, %v2160_v27 }
 0x4d9   : > { %3507 = vmatmul.mubr.msk.f32.vlgmr.msra.gmra.mrb[0].mxu1 %vm1818_vm2, %v1798_v18 }
 0x4da   : > { %3717 = vmatpush3.bf16.msra.mxu1 %v3716_v17  ;;  %3517 = vmatprep.mubr.msk.f32.mxu1 %vm4405_vm1, %v4406_v8  ;;  %v2159_v17 = vld [vmem:[#allocation3 + $0x18] sm:$0xff] }
 0x4db   : > { %3718 = vmatprep.subr.bf16.mxu1 %v4404_v5  ;;  %v3738_v18 = vpack.c.bf16 %v2159_v17, %v2158_v16 }
 0x4de   : > { %3720 = vmatpush3.bf16.msra.mxu1 %v3719_v0  ;;  %v2164_v0 = vld [vmem:[#allocation3 + $0x40] sm:$0xff] }
 0x4df   : > { %3721 = vmatprep.subr.bf16.mxu1 %v4404_v5  ;;  %v3750_v21 = vpack.c.bf16 %v2165_v63, %v2164_v0 }
 0x4e1   : > { %3518 = vmatmul.mubr.msk.f32.vlgmr.msra.gmra.mrb[2].mxu1 %vm1818_vm2, %v1799_v26  ;;  %3752 = vmatpush3.bf16.xpose.msk.msra.mxu0 %vm5038_vm4, %v3750_v21 }
 0x4e2   : > { %3723 = vmatpush3.bf16.msra.mxu1 %v3722_v22  ;;  %3528 = vmatprep.mubr.msk.f32.mxu1 %vm4405_vm1, %v4406_v8  ;;  %v2166_v22 = vld [vmem:[#allocation3 + $0x50] sm:$0xff] }
 0x4e3   : > { %3724 = vmatprep.subr.bf16.mxu1 %v4404_v5  ;;  %3753 = vmatprep.subr.bf16.mxu0 %v4404_v5  ;;  %v3754_v24 = vpack.c.bf16 %v2167_v23, %v2166_v22 }
 0x4e6   : > { %3726 = vmatpush3.bf16.msra.mxu1 %v3725_v29 }
 0x4e7   : > { %3727 = vmatprep.subr.bf16.mxu1 %v4404_v5 }
 0x4e9   : > { %3529 = vmatmul.mubr.msk.f32.vlgmr.msra.gmra.mrb[4].mxu1 %vm1818_vm2, %v1800_v13  ;;  %3756 = vmatpush3.bf16.xpose.msk.msra.mxu0 %vm5038_vm4, %v3754_v24  ;;  %v2163_v13 = vld [vmem:[#allocation3 + $0x38] sm:$0xff] }
 0x4ea   : > { %3729 = vmatpush3.bf16.msra.mxu1 %v3728_v34  ;;  %3539 = vmatprep.mubr.msk.f32.mxu1 %vm4405_vm1, %v4406_v8  ;;  %v2162_v34 = vld [vmem:[#allocation3 + $0x30] sm:$0xff] }
 0x4eb   : > { %3730 = vmatprep.subr.bf16.mxu1 %v4404_v5  ;;  %3765 = vmatprep.subr.bf16.mxu0 %v4404_v5  ;;  %v3746_v35 = vpack.c.bf16 %v2163_v13, %v2162_v34 }
 0x4ee   : > { %3732 = vmatpush3.bf16.msra.mxu1 %v3731_v37  ;;  %v2169_v37 = vld [vmem:[#allocation3 + $0x68] sm:$0xff] }
 0x4ef   : > { %3733 = vmatprep.subr.bf16.mxu1 %v4404_v5 }
 0x4f1   : > { %3540 = vmatmul.mubr.msk.f32.vlgmr.msra.gmra.mrb[6].mxu1 %vm1818_vm2, %v1801_v38 }
 0x4f2   : > { %3550 = vmatprep.mubr.msk.f32.mxu1 %vm4405_vm1, %v4406_v8 }
 0x4f7   : > { %3736 = vmatpush3.bf16.xpose.msk.msra.mxu1 %vm5038_vm4, %v3734_v62  ;;  %v2668_v62 = vld [vmem:[#allocation12 + $0x18] sm:$0xff] }
 0x4f8   : > { %3737 = vmatprep.subr.bf16.mxu1 %v4404_v5 }
 0x4ff   : > { %3740 = vmatpush3.bf16.xpose.msk.msra.mxu1 %vm5038_vm4, %v3738_v18 }
 0x500   : > { %3741 = vmatprep.subr.bf16.mxu1 %v4404_v5 }
 0x5ac   : > { %v1888_v39 = vpop.f32.mrb[0].mxu1 }
 0x5ad   : > { %v3508_v40 = vpop.f32.mrb[1].mxu1  ;;  %v2112_v41 = vsel %vm2111_vm3, %v1888_v39, -inf }
 0x5ae   : > { %2113 = vmax.xlane.f32.xlu1 %v2112_v41  ;;  %v3758_v40 = vpack.c.bf16 %v2169_v37, %v2168_v36 }
 0x5b4   : > { %v1961_v42 = vpop.f32.mrb[2].mxu1 }
 0x5b5   : > { %v3519_v44 = vpop.f32.mrb[3].mxu1  ;;  %v2115_v45 = vsel %vm2111_vm3, %v1961_v42, -inf }
 0x5b6   : > { %2116 = vmax.xlane.f32.xlu0 %v2115_v45  ;;  %v2170_v45 = vld [vmem:[#allocation3 + $0x70] sm:$0xff] }
 0x5bc   : > { %v2034_v46 = vpop.f32.mrb[4].mxu1 }
 0x5bd   : > { %v3530_v47 = vpop.f32.mrb[5].mxu1  ;;  %v2118_v48 = vsel %vm2111_vm3, %v2034_v46, -inf }
 0x5be   : > { %2119 = vmax.xlane.f32.xlu0 %v2118_v48 }
 0x5c4   : > { %v2107_v50 = vpop.f32.mrb[6].mxu1 }
 0x5c5   : > { %v3541_v57 = vpop.f32.mrb[7].mxu1  ;;  %v2121_v58 = vsel %vm2111_vm3, %v2107_v50, -inf }
 0x5c6   : > { %2122 = vmax.xlane.f32.xlu1 %v2121_v58  ;;  %v2665_v57 = vld [vmem:[#allocation12] sm:$0xff]  ;;  %v2666_v58 = vld [vmem:[#allocation12 + $0x8] sm:$0xff] }
 0x5c7   : > { %v3766_v60 = vpack.c.bf16 %v2666_v58, %v2665_v57 }
 0x63b   : > { %v2114_v1 = vpop.xlane.xlu1 %2113 }
 0x63c   : > { %v2124_v2 = vsub.f32 %v1888_v39, %v2114_v1  ;;  %v3769_v1 = vpack.c.bf16 %v2668_v62, %v2667_v59 }
 0x63e   : > { %v2128_v3 = vmul.f32 1.442695, %v2124_v2  ;;  %v2669_v2 = vld [vmem:[#allocation12 + $0x20] sm:$0xff] }
 0x640   : > { %4034 = vpow2.f32 %v2128_v3  ;;  %v2670_v3 = vld [vmem:[#allocation12 + $0x28] sm:$0xff] }
 0x641   : > { %v3772_v61 = vpack.c.bf16 %v2670_v3, %v2669_v2 }
 0x643   : > { %v2117_v4 = vpop.xlane.xlu0 %2116 }
 0x644   : > { %v2125_v51 = vsub.f32 %v1961_v42, %v2117_v4  ;;  %v2671_v4 = vld [vmem:[#allocation12 + $0x30] sm:$0xff] }
 0x646   : > { %v2130_v54 = vmul.f32 1.442695, %v2125_v51  ;;  %v2672_v51 = vld [vmem:[#allocation12 + $0x38] sm:$0xff] }
 0x648   : > { %4036 = vpow2.f32 %v2130_v54  ;;  %v3775_v54 = vpack.c.bf16 %v2672_v51, %v2671_v4 }
 0x64a   : > { %v4035_v55 = vpop.eup %4034 }
 0x64b   : > { %v2120_v56 = vpop.xlane.xlu0 %2119  ;;  %v2136_v6 = vsel %vm2111_vm3, %v4035_v55, 0.0 }
 0x64c   : > { %v2126_v7 = vsub.f32 %v2034_v46, %v2120_v56  ;;  %2137 = vadd.xlane.f32.xlu0 %v2136_v6  ;;  %v2171_v46 = vld [vmem:[#allocation3 + $0x78] sm:$0xff]  ;;  %v2675_v6 = vld [vmem:[#allocation12 + $0x50] sm:$0xff] }
 0x64d   : > { %v3762_v47 = vpack.c.bf16 %v2171_v46, %v2170_v45 }
 0x64e   : > { %v2132_v9 = vmul.f32 1.442695, %v2126_v7  ;;  %v2676_v7 = vld [vmem:[#allocation12 + $0x58] sm:$0xff] }
 0x650   : > { %4038 = vpow2.f32 %v2132_v9  ;;  %v3781_v9 = vpack.c.bf16 %v2676_v7, %v2675_v6  ;;  %v2784_v6 = vld [vmem:[#allocation13 + $0x10] sm:$0xff]  ;;  %v2787_v7 = vld [vmem:[#allocation13 + $0x28] sm:$0xff] }
 0x652   : > { %v4037_v10 = vpop.eup %4036 }
 0x653   : > { %v2123_v11 = vpop.xlane.xlu1 %2122  ;;  %v2139_v12 = vsel %vm2111_vm3, %v4037_v10, 0.0 }
 0x654   : > { %v2127_v53 = vsub.f32 %v2107_v50, %v2123_v11  ;;  %2140 = vadd.xlane.f32.xlu1 %v2139_v12  ;;  %v2678_v11 = vld [vmem:[#allocation12 + $0x68] sm:$0xff] }
 0x656   : > { %v2134_v14 = vmul.f32 1.442695, %v2127_v53 }
 0x658   : > { %4040 = vpow2.f32 %v2134_v14 }
 0x65a   : > { %v4039_v52 = vpop.eup %4038 }
 0x65b   : > { %v2142_v15 = vsel %vm2111_vm3, %v4039_v52, 0.0 }
 0x65c   : > { %2143 = vadd.xlane.f32.xlu0 %v2142_v15 }
 0x662   : > { %v4041_v19 = vpop.eup %4040 }
 0x663   : > { %v2145_v20 = vsel %vm2111_vm3, %v4041_v19, 0.0 }
 0x664   : > { %2146 = vadd.xlane.f32.xlu1 %v2145_v20 }
 0x6d9   : > { %v2138_v26 = vpop.xlane.xlu0 %2137 }
 0x6da   : > { %4042 = vrcp.f32 %v2138_v26 }
 0x6e1   : > { %v2141_v32 = vpop.xlane.xlu1 %2140 }
 0x6e2   : > { %4044 = vrcp.f32 %v2141_v32 }
 0x6e4   : > { %v4043_v29 = vpop.eup %4042 }
 0x6e5   : > { %v2152_v31 = vmul.f32 %v4043_v29, %v4035_v55  ;;  %v2674_v55 = vld [vmem:[#allocation12 + $0x48] sm:$0xff] }
 0x6e7   : > { %3551 = vmatmul.mubr.msk.f32.vlgmr.msra.gmra.mrb[8].mxu1 %vm2111_vm3, %v2152_v31  ;;  %v2680_v31 = vld [vmem:[#allocation12 + $0x78] sm:$0xff] }
 0x6e8   : > { %3744 = vmatpush3.bf16.xpose.msk.msra.mxu1 %vm5038_vm4, %v3742_v30  ;;  %3561 = vmatprep.mubr.msk.f32.mxu1 %vm4405_vm1, %v4406_v8  ;;  %v2679_v30 = vld [vmem:[#allocation12 + $0x70] sm:$0xff] }
 0x6e9   : > { %v2144_v33 = vpop.xlane.xlu0 %2143  ;;  %3745 = vmatprep.subr.bf16.mxu1 %v4404_v5  ;;  %v3787_v32 = vpack.c.bf16 %v2680_v31, %v2679_v30  ;;  %v2798_v30 = vld [vmem:[#allocation13 + $0x80] sm:$0xff]  ;;  %v2800_v31 = vld [vmem:[#allocation13 + $0x90] sm:$0xff] }
 0x6ea   : > { %4046 = vrcp.f32 %v2144_v33 }
 0x6ec   : > { %v4045_v38 = vpop.eup %4044 }
 0x6ed   : > { %v2153_v41 = vmul.f32 %v4045_v38, %v4037_v10  ;;  %v2677_v10 = vld [vmem:[#allocation12 + $0x60] sm:$0xff] }
 0x6ee   : > { %v3784_v12 = vpack.c.bf16 %v2678_v11, %v2677_v10 }
 0x6f0   : > { %3748 = vmatpush3.bf16.xpose.msk.msra.mxu1 %vm5038_vm4, %v3746_v35 }
 0x6f1   : > { %3757 = vmatprep.subr.bf16.mxu1 %v4404_v5  ;;  %v2147_v44 = vpop.xlane.xlu1 %2146 }
 0x6f2   : > { %4048 = vrcp.f32 %v2147_v44 }
 0x6f4   : > { %v4047_v39 = vpop.eup %4046 }
 0x6f5   : > { %v2154_v42 = vmul.f32 %v4047_v39, %v4039_v52 }
 0x6f7   : > { %3562 = vmatmul.mubr.msk.f32.vlgmr.msra.gmra.mrb[10].mxu1 %vm2111_vm3, %v2153_v41  ;;  %3573 = vmatmul.mubr.msk.f32.vlgmr.msra.gmra.mrb[2].mxu0 %vm2111_vm3, %v2154_v42 }
 0x6f8   : > { %3760 = vmatpush3.bf16.xpose.msk.msra.mxu1 %vm5038_vm4, %v3758_v40  ;;  %3583 = vmatprep.mubr.msk.f32.mxu1 %vm4405_vm1, %v4406_v8 }
 0x6f9   : > { %3761 = vmatprep.subr.bf16.mxu1 %v4404_v5  ;;  %3618 = vmatprep.mubr.msk.f32.mxu0 %vm4405_vm1, %v4406_v8 }
 0x6fa   : > { %3767 = vmatpush3.bf16.msra.mxu0 %v3766_v60 }
 0x6fb   : > { %3768 = vmatprep.subr.bf16.mxu0 %v4404_v5 }
 0x6fc   : > { %v4049_v48 = vpop.eup %4048 }
 0x6fd   : > { %v2155_v50 = vmul.f32 %v4049_v48, %v4041_v19 }
 0x6fe   : > { %3770 = vmatpush3.bf16.msra.mxu0 %v3769_v1 }
 0x6ff   : > { %3771 = vmatprep.subr.bf16.mxu0 %v4404_v5 }
 0x700   : > { %3764 = vmatpush3.bf16.xpose.msk.msra.mxu1 %vm5038_vm4, %v3762_v47 }
 0x702   : > { %3773 = vmatpush3.bf16.msra.mxu0 %v3772_v61 }
 0x703   : > { %3774 = vmatprep.subr.bf16.mxu0 %v4404_v5 }
 0x706   : > { %3776 = vmatpush3.bf16.msra.mxu0 %v3775_v54 }
 0x707   : > { %3584 = vmatmul.mubr.msk.f32.vlgmr.msra.gmra.mrb[12].mxu1 %vm2111_vm3, %v2155_v50  ;;  %3777 = vmatprep.subr.bf16.mxu0 %v4404_v5 }
 0x708   : > { %2878 = vmatprep.mubr.f32.mxu1 %v4406_v8  ;;  %v2673_v8 = vld [vmem:[#allocation12 + $0x40] sm:$0xff] }
 0x709   : > { %v3778_v56 = vpack.c.bf16 %v2674_v55, %v2673_v8  ;;  %v2785_v8 = vld [vmem:[#allocation13 + $0x18] sm:$0xff]  ;;  %v2782_v55 = vld [vmem:[#allocation13] sm:$0xff] }
 0x70a   : > { %v3791_v10 = vpack.c.bf16 %v2784_v6, %v2782_v55  ;;  %v2892_v6 = vld [vmem:[#allocation15 + $0x28] sm:$0xff] }
 0x70b   : > { %3779 = vmatpush3.bf16.msra.mxu0 %v3778_v56 }
 0x70c   : > { %3780 = vmatprep.subr.bf16.mxu0 %v4404_v5 }
 0x70f   : > { %3782 = vmatpush3.bf16.msra.mxu0 %v3781_v9  ;;  %v2789_v9 = vld [vmem:[#allocation13 + $0x38] sm:$0xff] }
 0x710   : > { %3783 = vmatprep.subr.bf16.mxu0 %v4404_v5  ;;  %v3793_v11 = vpack.c.bf16 %v2789_v9, %v2787_v7  ;;  %v2909_v7 = vld [vmem:[#allocation15 + $0xb0] sm:$0xff]  ;;  %v2910_v9 = vld [vmem:[#allocation15 + $0xb8] sm:$0xff] }
 0x713   : > { %3785 = vmatpush3.bf16.msra.mxu0 %v3784_v12  ;;  %v2786_v12 = vld [vmem:[#allocation13 + $0x20] sm:$0xff] }
 0x714   : > { %3786 = vmatprep.subr.bf16.mxu0 %v4404_v5 }
 0x717   : > { %3788 = vmatpush3.bf16.msra.mxu0 %v3787_v32  ;;  %v3807_v32 = vpack.c.bf16 %v2800_v31, %v2798_v30 }
 0x7ba   : > { %v2253_v53 = vpop.f32.mrb[8].mxu1 }
 0x7bb   : > { %v3552_v14 = vpop.f32.mrb[9].mxu1 }
 0x7ca   : > { %v2338_v52 = vpop.f32.mrb[10].mxu1  ;;  %v2423_v15 = vpop.f32.mrb[2].mxu0 }
 0x7cb   : > { %v2512_v16 = vcombine.low %v2253_v53, %v2423_v15  ;;  %v2513_v17 = vcombine.high %v2253_v53, %v2423_v15  ;;  %v3563_v18 = vpop.f32.mrb[11].mxu1  ;;  %v3574_v19 = vpop.f32.mrb[3].mxu0  ;;  %v2788_v53 = vld [vmem:[#allocation13 + $0x30] sm:$0xff] }
 0x7cc   : > { %v3795_v14 = vpack.c.bf16 %v2788_v53, %v2786_v12  ;;  %v2791_v18 = vld [vmem:[#allocation13 + $0x48] sm:$0xff]  ;;  %v2793_v19 = vld [vmem:[#allocation13 + $0x58] sm:$0xff]  ;;  %v2893_v12 = vld [vmem:[#allocation15 + $0x30] sm:$0xff] }
 0x7cd   : > { %v2520_v22 = vrot.slane %v2512_v16, %v4994_v43  ;;  %v2527_v23 = vrot.slane %v2513_v17, %v4994_v43  ;;  %v2894_v53 = vld [vmem:[#allocation15 + $0x38] sm:$0xff] }
 0x7da   : > { %v2508_v20 = vpop.f32.mrb[12].mxu1 }
 0x7db   : > { %v2528_v0 = vcombine.low %v2338_v52, %v2508_v20  ;;  %v2529_v63 = vcombine.high %v2338_v52, %v2508_v20  ;;  %v3585_v21 = vpop.f32.mrb[13].mxu1  ;;  %v3797_v20 = vpack.c.bf16 %v2793_v19, %v2791_v18  ;;  %v2895_v18 = vld [vmem:[#allocation15 + $0x40] sm:$0xff]  ;;  %v2896_v19 = vld [vmem:[#allocation15 + $0x48] sm:$0xff] }
 0x7dd   : > { %v2536_v24 = vrot.slane %v2528_v0, %v4994_v43  ;;  %v2543_v5 = vrot.slane %v2529_v63, %v4994_v43  ;;  %v2790_v0 = vld [vmem:[#allocation13 + $0x40] sm:$0xff]  ;;  %v2792_v63 = vld [vmem:[#allocation13 + $0x50] sm:$0xff] }
 0x7de   : > { %v3799_v21 = vpack.c.bf16 %v2792_v63, %v2790_v0  ;;  %v2914_v0 = vld [vmem:[#allocation15 + $0xd8] sm:$0xff]  ;;  %v3839_v63 = vpack.c.bf16 %v2896_v19, %v2895_v18 }
 0x7df   : > { %v2544_v26 = vcombine.low %v2520_v22, %v2536_v24  ;;  %v2545_v27 = vcombine.high %v2520_v22, %v2536_v24  ;;  %v2560_v28 = vcombine.low %v2527_v23, %v2543_v5  ;;  %v2561_v29 = vcombine.high %v2527_v23, %v2543_v5  ;;  %v2795_v22 = vld [vmem:[#allocation13 + $0x68] sm:$0xff]  ;;  %v2797_v23 = vld [vmem:[#allocation13 + $0x78] sm:$0xff]  ;;  %v2796_v5 = vld [vmem:[#allocation13 + $0x70] sm:$0xff] }
 0x7e0   : > { %v3801_v24 = vpack.c.bf16 %v2797_v23, %v2795_v22  ;;  %v2897_v22 = vld [vmem:[#allocation15 + $0x50] sm:$0xff]  ;;  %v2898_v23 = vld [vmem:[#allocation15 + $0x58] sm:$0xff] }
 0x7e1   : > { %v2552_v33 = vrot.slane %v2544_v26, %v4996_v49  ;;  %v2559_v34 = vrot.slane %v2545_v27, %v4996_v49  ;;  %v2568_v13 = vrot.slane %v2560_v28, %v4996_v49  ;;  %v2575_v35 = vrot.slane %v2561_v29, %v4996_v49  ;;  %v2799_v27 = vld [vmem:[#allocation13 + $0x88] sm:$0xff]  ;;  %v2801_v28 = vld [vmem:[#allocation13 + $0x98] sm:$0xff] }
 0x7e2   : > { %v3805_v29 = vpack.c.bf16 %v2801_v28, %v2799_v27  ;;  %v2899_v27 = vld [vmem:[#allocation15 + $0x60] sm:$0xff]  ;;  %v2900_v28 = vld [vmem:[#allocation15 + $0x68] sm:$0xff] }
 0x7e3   : > { %v2580_v36 = vcombine.low %v2552_v33, %v2559_v34  ;;  %v3236_v37 = vcombine.high %v2552_v33, %v2559_v34  ;;  %v2596_v38 = vcombine.low %v2568_v13, %v2575_v35  ;;  %v3237_v39 = vcombine.high %v2568_v13, %v2575_v35  ;;  %v2803_v33 = vld [vmem:[#allocation13 + $0xa8] sm:$0xff]  ;;  %v2805_v34 = vld [vmem:[#allocation13 + $0xb8] sm:$0xff]  ;;  %v2802_v13 = vld [vmem:[#allocation13 + $0xa0] sm:$0xff] }
 0x7e4   : > { %v3809_v35 = vpack.c.bf16 %v2805_v34, %v2803_v33 }
 0x7e5   : > { %v2587_v40 = vrot.slane %v2580_v36, %v4994_v43  ;;  %v2595_v41 = vrot.slane %v3236_v37, %v4994_v43  ;;  %v2603_v42 = vrot.slane %v2596_v38, %v4994_v43  ;;  %v2611_v44 = vrot.slane %v3237_v39, %v4994_v43  ;;  %v2804_v36 = vld [vmem:[#allocation13 + $0xb0] sm:$0xff]  ;;  %v2807_v37 = vld [vmem:[#allocation13 + $0xc8] sm:$0xff]  ;;  %v2809_v38 = vld [vmem:[#allocation13 + $0xd8] sm:$0xff] }
 0x7e6   : > { %v3811_v39 = vpack.c.bf16 %v2804_v36, %v2802_v13 }
 0x7e7   : > { %v2613_v45 = vcombine.high %v2587_v40, %v2595_v41  ;;  %v2629_v46 = vcombine.high %v2603_v42, %v2611_v44  ;;  %v2612_v47 = vcombine.low %v2587_v40, %v2595_v41  ;;  %v2628_v48 = vcombine.low %v2603_v42, %v2611_v44  ;;  %v2806_v41 = vld [vmem:[#allocation13 + $0xc0] sm:$0xff]  ;;  %v2808_v42 = vld [vmem:[#allocation13 + $0xd0] sm:$0xff]  ;;  %v2811_v44 = vld [vmem:[#allocation13 + $0xe8] sm:$0xff] }
 0x7e8   : > { %v3813_v40 = vpack.c.bf16 %v2809_v38, %v2807_v37  ;;  %v3238_v38 = vld [vmem:[%s5272_s30] ss:$0 sm:$0xff]  ;;  %s5276_s30 = sld [smem:[#allocation36_spill]] }
 0x7e9   : > { %v2627_v50 = vrot.slane %v2613_v45, %v4996_v49  ;;  %v2643_v57 = vrot.slane %v2629_v46, %v4996_v49  ;;  %v2620_v58 = vrot.slane %v2612_v47, %v4996_v49  ;;  %v2636_v59 = vrot.slane %v2628_v48, %v4996_v49  ;;  %v2783_v49 = vld [vmem:[#allocation13 + $0x8] sm:$0xff]  ;;  %v2813_v45 = vld [vmem:[#allocation13 + $0xf8] sm:$0xff]  ;;  %v2810_v48 = vld [vmem:[#allocation13 + $0xe0] sm:$0xff] }
 0x7ea   : > { %v3789_v56 = vpack.c.bf16 %v2785_v8, %v2783_v49  ;;  %v3815_v46 = vpack.c.bf16 %v2808_v42, %v2806_v41  ;;  %v3817_v47 = vpack.c.bf16 %v2813_v45, %v2811_v44  ;;  %v2908_v49 = vld [vmem:[#allocation15 + $0xa8] sm:$0xff]  ;;  %v2917_v44 = vld [vmem:[#allocation15 + $0xf0] sm:$0xff]  ;;  %v2918_v45 = vld [vmem:[#allocation15 + $0xf8] sm:$0xff] }
 0x7eb   : > { %v2646_v60 = vcombine.low %v2627_v50, %v2643_v57  ;;  %v2645_v62 = vcombine.high %v2620_v58, %v2636_v59  ;;  %v2647_v1 = vcombine.high %v2627_v50, %v2643_v57  ;;  %v2644_v2 = vcombine.low %v2620_v58, %v2636_v59  ;;  %v2812_v50 = vld [vmem:[#allocation13 + $0xf0] sm:$0xff]  ;;  %v2903_v58 = vld [vmem:[#allocation15 + $0x80] sm:$0xff]  ;;  %v2904_v59 = vld [vmem:[#allocation15 + $0x88] sm:$0xff] }
 0x7ec   : > { %3790 = vmatprep.subr.bf16.mxu1 %v3789_v56  ;;  %v3819_v57 = vpack.c.bf16 %v2812_v50, %v2810_v48  ;;  %v2891_v56 = vld [vmem:[#allocation15 + $0x20] sm:$0xff]  ;;  %v2902_v48 = vld [vmem:[#allocation15 + $0x78] sm:$0xff] }
 0x7ed   : > { %2653 = vrot.lane.b32.xlu1 %v2646_v60, %s4409_s23  ;;  %2649 = vrot.lane.b32.xlu0 %v2645_v62, %s4407_s12  ;;  %v2887_v60 = vld [vmem:[#allocation15] sm:$0xff]  ;;  %v3821_v62 = vpack.c.bf16 %v2904_v59, %v2903_v58  ;;  %s5275_s23 = sld [smem:[#allocation35_spill]]  ;;  %s4252_s12 = scalar_lea.vmem %s5135_s29, 128 }
 0x7ee   : > { %3792 = vmatpush1.bf16.msra.mxu1 %v3791_v10  ;;  %v3831_v10 = vpack.c.bf16 %v2892_v6, %v2891_v56  ;;  %p4253_p13 = scmp.ne.s32.totalorder %s5135_s29, %s4252_s12 }
 0x7ef   : > { %3794 = vmatprep.subr.bf16.mxu1 %v3793_v11  ;;  %3822 = vmatprep.subr.bf16.mxu0 %v3821_v62  ;;  %v3833_v11 = vpack.c.bf16 %v2910_v9, %v2909_v7  ;;  %v3241_v9 = vld [vmem:[%s5276_s30] ss:$0 sm:$0xff] }
 0x7f0   : > { %p4254_p9 = pnand %p4253_p13, %p5279_p6 }
 0x7f1   : > { %2657 = vrot.lane.b32.xlu1 %v2647_v1, %s4408_s3  ;;  %v2888_v1 = vld [vmem:[#allocation15 + $0x8] sm:$0xff]  ;;  %s4256_s3 = sshll.u32 %s4412_s2, 4  ;;  %s4257_s3 = int_to_ptr.vmem [resolvable:$false] %s4256_s3 }
 0x7f2   : > { %3796 = vmatpush1.bf16.msra.mxu1 %v3795_v14  ;;  %v2911_v14 = vld [vmem:[#allocation15 + $0xc0] sm:$0xff]  ;;  %p4255_p11 = pneg %p4254_p9  ;;  %p4259_p12 = scmp.lt.s32.totalorder %s5135_s29, %s4257_s3 }
 0x7f3   : > { %3798 = vmatprep.subr.bf16.mxu1 %v3797_v20  ;;  %v2913_v20 = vld [vmem:[#allocation15 + $0xd0] sm:$0xff]  ;;  %v3240_v6 = vld [vmem:[%s5275_s23] ss:$0 sm:$0xff]  ;;  %s4258_s23 = scalar_lea.vmem %s4257_s3, 256 }
 0x7f4   : > { %p4260_p1 = scmp.lt.s32.totalorder %s4258_s23, %s4252_s12 }
 0x7f6   : > { %3800 = vmatpush1.bf16.msra.mxu1 %v3799_v21  ;;  %v3841_v21 = vpack.c.bf16 %v2914_v0, %v2913_v20  ;;  %p4261_p0 = por %p4260_p1, %p4259_p12 }
 0x7f7   : > { %3802 = vmatprep.subr.bf16.mxu1 %v3801_v24  ;;  %v2915_v24 = vld [vmem:[#allocation15 + $0xe0] sm:$0xff] }
 0x7f8   : > { %p4262_p7 = pnand %p4261_p0, %p4255_p11 }
 0x85f   : > { %v2654_v43 = vpop.permute.xlu1 %2653  ;;  %v2650_v3 = vpop.permute.xlu0 %2649 }
 0x860   : > { %v2660_v61 = vsel %vm1818_vm2, %v2644_v2, %v2650_v3  ;;  %v2905_v2 = vld [vmem:[#allocation15 + $0x90] sm:$0xff]  ;;  %v3823_v3 = vpack.c.bf16 %v2888_v1, %v2887_v60 }
 0x861   : > { %v2662_v51 = vsel %vm2661_vm5, %v2660_v61, %v2654_v43  ;;  %v2906_v43 = vld [vmem:[#allocation15 + $0x98] sm:$0xff] }
 0x862   : > { %v3825_v61 = vpack.c.bf16 %v2906_v43, %v2905_v2 }
 0x863   : > { %v2658_v4 = vpop.permute.xlu1 %2657 }
 0x864   : > { %v2664_v54 = vsel %vm2663_vm6, %v2662_v51, %v2658_v4  ;;  %v2889_v4 = vld [vmem:[#allocation15 + $0x10] sm:$0xff]  ;;  %v2890_v51 = vld [vmem:[#allocation15 + $0x18] sm:$0xff] }
 0x865   : > { %3619 = vmatmul.mubr.f32.vlgmr.msra.gmra.mrb[4].mxu0 %v2664_v54  ;;  %v2907_v54 = vld [vmem:[#allocation15 + $0xa0] sm:$0xff]  ;;  %v3827_v8 = vpack.c.bf16 %v2890_v51, %v2889_v4 }
 0x866   : > { %3824 = vmatpush3.bf16.msra.mxu0 %v3823_v3  ;;  %v3829_v55 = vpack.c.bf16 %v2908_v49, %v2907_v54 }
 0x867   : > { %3826 = vmatprep.subr.bf16.mxu0 %v3825_v61 }
 0x86a   : > { %3828 = vmatpush3.bf16.msra.mxu0 %v3827_v8 }
 0x86b   : > { %3830 = vmatprep.subr.bf16.mxu0 %v3829_v55 }
 0x86e   : > { %3832 = vmatpush3.bf16.msra.mxu0 %v3831_v10 }
 0x86f   : > { %3834 = vmatprep.subr.bf16.mxu0 %v3833_v11 }
 0x938   : > { %v2747_v52 = vpop.f32.mrb[4].mxu0 }
 0x939   : > { %v5108_v15 = vadd.f32 %v2747_v52, %v4983_v25  ;;  %v3620_v16 = vpop.f32.mrb[5].mxu0  ;;  %v2794_v25 = vld [vmem:[#allocation13 + $0x60] sm:$0xff]  ;;  %v2912_v52 = vld [vmem:[#allocation15 + $0xc8] sm:$0xff] }
 0x93a   : > { %v3803_v26 = vpack.c.bf16 %v2796_v5, %v2794_v25  ;;  %v3835_v16 = vpack.c.bf16 %v2894_v53, %v2893_v12  ;;  %v2916_v25 = vld [vmem:[#allocation15 + $0xe8] sm:$0xff]  ;;  %v3843_v5 = vpack.c.bf16 %v2898_v23, %v2897_v22 }
 0x93b   : > { %2752 = vadd.xlane.f32.xlu0 %v5108_v15  ;;  %v2756_v17 = vmul.f32 %v5108_v15, %v5108_v15 }
 0x93c   : > { %3804 = vmatpush1.bf16.msra.mxu1 %v3803_v26  ;;  %3836 = vmatpush3.bf16.msra.mxu0 %v3835_v16  ;;  %v3845_v26 = vpack.c.bf16 %v2916_v25, %v2915_v24 }
 0x93d   : > { %2757 = vadd.xlane.f32.xlu1 %v2756_v17  ;;  %3806 = vmatprep.subr.bf16.mxu1 %v3805_v29  ;;  %v3837_v17 = vpack.c.bf16 %v2912_v52, %v2911_v14  ;;  %v3847_v29 = vpack.c.bf16 %v2900_v28, %v2899_v27 }
 0x93f   : > { %3838 = vmatprep.subr.bf16.mxu0 %v3837_v17 }
 0x940   : > { %3808 = vmatpush1.bf16.msra.mxu1 %v3807_v32  ;;  %3840 = vmatpush3.bf16.msra.mxu0 %v3839_v63 }
 0x941   : > { %3810 = vmatprep.subr.bf16.mxu1 %v3809_v35  ;;  %3842 = vmatprep.subr.bf16.mxu0 %v3841_v21 }
 0x944   : > { %3812 = vmatpush1.bf16.msra.mxu1 %v3811_v39  ;;  %3844 = vmatpush3.bf16.msra.mxu0 %v3843_v5 }
 0x945   : > { %3814 = vmatprep.subr.bf16.mxu1 %v3813_v40  ;;  %3846 = vmatprep.subr.bf16.mxu0 %v3845_v26  ;;  %v3239_v40 = vld [vmem:[%s5273_s7] ss:$0 sm:$0xff] }
 0x948   : > { %3816 = vmatpush1.bf16.msra.mxu1 %v3815_v46  ;;  %3848 = vmatpush3.bf16.msra.mxu0 %v3847_v29  ;;  %v3849_v46 = vpack.c.bf16 %v2918_v45, %v2917_v44 }
 0x949   : > { %3818 = vmatprep.subr.bf16.mxu1 %v3817_v47  ;;  %v2901_v47 = vld [vmem:[#allocation15 + $0x70] sm:$0xff] }
 0x94a   : > { %v3851_v50 = vpack.c.bf16 %v2902_v48, %v2901_v47  ;;  %3850 = vmatprep.subr.bf16.mxu0 %v3849_v46 }
 0x94c   : > { %3820 = vmatpush1.bf16.msra.mxu1 %v3819_v57  ;;  %3852 = vmatpush3.bf16.msra.mxu0 %v3851_v50 }
 0x9c8   : > { %v2753_v30 = vpop.xlane.xlu0 %2752 }
 0x9c9   : > { %v2755_v31 = vmul.f32 0.0078125, %v2753_v30 }
 0x9ca   : > { %v2758_v32 = vpop.xlane.xlu1 %2757 }
 0x9cb   : > { %v2760_v33 = vmul.f32 %v2755_v31, %v2755_v31  ;;  %v2759_v34 = vmul.f32 0.0078125, %v2758_v32  ;;  %v2762_v36 = vsub.f32 %v5108_v15, %v2755_v31 }
 0x9cd   : > { %v2761_v13 = vsub.f32 %v2759_v34, %v2760_v33 }
 0x9cf   : > { %v2763_v35 = vadd.f32 1e-05, %v2761_v13 }
 0x9d1   : > { %4050 = vrsqrt.f32 %v2763_v35 }
 0x9db   : > { %v4051_v37 = vpop.eup %4050 }
 0x9dc   : > { %v2765_v39 = vmul.f32 %v4051_v37, %v2762_v36 }
 0x9de   : > { %v2773_v41 = vmul.f32 %v3238_v38, %v2765_v39 }
 0x9e0   : > { %v2781_v42 = vadd.f32 %v3239_v40, %v2773_v41 }
 0x9e2   : > { %2879 = vmatmul.mubr.f32.vlgmr.msra.gmra.mrb[14].mxu1 %v2781_v42 }
 0xab5   : > { %v2880_v15 = vpop.f32.mrb[14].mxu1 }
 0xab6   : > { %v2882_v57 = vpop.f32.mrb[15].mxu1  ;;  %v2885_v59 = vmax.f32 %v2880_v15, 0.0 }
 0xab7   : > { %v2886_v58 = vmax.f32 %v2882_v57, 0.0 }
 0xab9   : > { %2983 = vmatprep.mubr.f32.mxu0 %v2886_v58 }
 0xaba   : > { %2984 = vmatmul.mubr.f32.vlgmr.msra.gmra.mrb[6].mxu0 %v2885_v59 }
 0xb8d   : > { %v3390_v60 = vpop.f32.mrb[6].mxu0 }
 0xb8e   : > { %v3391_v62 = vpop.f32.mrb[7].mxu0 }
 0xb8f   : > { %v3392_v1 = vadd.f32 %v3391_v62, %v3390_v60 }
 0xb91   : > { %v2989_v2 = vadd.f32 %v3392_v1, %v2781_v42 }
 0xb93   : > { %2990 = vadd.xlane.f32.xlu0 %v2989_v2  ;;  %v2993_v43 = vmul.f32 %v2989_v2, %v2989_v2 }
 0xb97   : > { %2994 = vadd.xlane.f32.xlu0 %v2993_v43 }
 0xc20   : > { %v2991_v3 = vpop.xlane.xlu0 %2990 }
 0xc21   : > { %v2992_v61 = vmul.f32 0.0078125, %v2991_v3 }
 0xc23   : > { %v2997_v51 = vmul.f32 %v2992_v61, %v2992_v61  ;;  %v2999_v55 = vsub.f32 %v2989_v2, %v2992_v61 }
 0xc24   : > { %v2995_v4 = vpop.xlane.xlu0 %2994 }
 0xc25   : > { %v2996_v54 = vmul.f32 0.0078125, %v2995_v4 }
 0xc27   : > { %v2998_v49 = vsub.f32 %v2996_v54, %v2997_v51 }
 0xc29   : > { %v3000_v8 = vadd.f32 1e-05, %v2998_v49 }
 0xc2b   : > { %4052 = vrsqrt.f32 %v3000_v8 }
 0xc35   : > { %v4053_v56 = vpop.eup %4052 }
 0xc36   : > { %v3002_v7 = vmul.f32 %v4053_v56, %v2999_v55 }
 0xc38   : > { %v3010_v10 = vmul.f32 %v3240_v6, %v3002_v7 }
 0xc3a   : > { %v3018_v11 = vadd.f32 %v3241_v9, %v3010_v10 }
 0xc3c   : > { %3019 = vst [vmem:[%s505_s9] sm:$0xff] %v3018_v11 }
 0xc3d   : > { %4265 = shalt.err (!%p4262_p7)
}
 0xc3e   : > { %s4266_s8 = scalar_lea.hbm %s5133_s4, 128  ;;  %s4270_s24 = scalar_lea.hbm %s5277_s5, 512 }
 0xc3f   : > { %p4267_p2 = scmp.ne.s32.totalorder %s5133_s4, %s4266_s8  ;;  %p4271_p3 = scmp.lt.u32.totalorder %s5133_s4, %s5277_s5 }
 0xc40   : > { %p4272_p8 = scmp.lt.u32.totalorder %s4270_s24, %s4266_s8  ;;  %p4274_p13 = scmp.lt.u32.totalorder %s4266_s8, %s5133_s4 }
 0xc41   : > { %p4268_p4 = pnand %p4267_p2, %p5279_p6 }
 0xc42   : > { %p4273_p5 = por %p4272_p8, %p4271_p3 }
 0xc43   : > { %p4269_p10 = pneg %p4268_p4 }
 0xc44   : > { %p4275_p9 = por %p4274_p13, %p4273_p5 }
 0xc46   : > { %p4276_p11 = pnand %p4275_p9, %p4269_p10 }
 0xc48   : > { %4279 = shalt.err (!%p4276_p11)
}
 0xc49   : > { %3879 = dma.vmem_to_hbm [thread:$0]  (%p5279_p6), %s5135_s29, 128, %s5133_s4, %s3021_s16  }
 0xc4a PF: > { %s5280_s7 = sld [smem:[#allocation22_spill]]  ;;  %p3921_p12 = scmp.ge.s32.totalorder %s4386_s27, 2 }
 0xc4b   : > { %p5281_p1 = scmp.ne.s32.totalorder %s5261_s1, 0 }
 0xc4d   : > { %p3905_p0 = pnand %p3921_p12, %p5281_p1 }
 0xc50   : > { %s3048_s10 = sand.u32 1, %s5280_s7  }
 0xc51   : > { %s3049_s20 = scalar_lea.sflag [#allocation6], %s3048_s10 }
 0xc52   : > { %4341 = dma.done.wait (!%p3905_p0), %s3049_s20, 128  }
 0xc53   : > { %4343 = vsyncadd (!%p3905_p0), %s3049_s20, 4294967168  ;;  %s30_s27 = sadd.s32 1, %s4386_s27   ;;  %s5282_s17 = smov %s4350_s18 }
 0xc54   : > { %p27_p7 = scmp.ge.s32.totalorder %s30_s27, 6   ;;  %s5283_s18 = smov %s4354_s19 }
 0xc55   : > { %s5284_s19 = smov %s4751_s0  ;;  %s5285_s20 = smov %s4362_s21 }
 0xc56   : > { %s5286_s21 = smov %s4366_s22  ;;  %s5287_s22 = smov %s4748_s14 }
 0xc57   : > { %s5288_s23 = smov %s4378_s25  ;;  %s5289_s24 = smov %s4382_s26 }
 0xc58   : > { %s5290_s25 = smov %s5293_s15  ;;  %s5291_s26 = smov %s5297_s13 }
 0xc59   :  { %29 = sbr.rel (!%p27_p7) target bundleno = 24 (0x18), region = 138 }
 0xc60   :  { %3054 = vsyncpa [#allocation5], 1 }
 0xc61   :  { %3056 = vsyncpa [#allocation5 + $0x1], 1 }
 0xc62   :  { %3057 = vsyncpa [#allocation8], 1 }
 0xc63   :  { %3058 = vsyncpa [#allocation11], 1 }
 0xc64   :  { %3059 = vsyncpa [#allocation14], 1 }
 0xc65   :  { %3060 = vsyncpa [#allocation6], 1 }
 0xc66   :  { %3062 = vsyncpa [#allocation6 + $0x1], 1 }

</bundles_post_ra>
